<compile_context>
chip_gen: v7x
topology: tpu7x:2x2x1
jax: 0.10.0
libtpu: 0.0.40
codegen_flags: <defaults>
</compile_context>

<pallas_src>
import jax
import jax.numpy as jnp
import numpy as np
from jax import lax
from jax.experimental import pallas as pl
from jax.experimental.pallas import tpu as pltpu


# ---------------------------------------------------------------------------
# Fused Pallas kernel
# ---------------------------------------------------------------------------
def _make_fused_kernel(L, T, Bp, H):
    """Single fused kernel: L stacked LSTM layers over T steps + fc head."""

    def cell(gates, c_prev):
        # PyTorch gate order i, f, g, o.  Nonlinearities evaluated once on the
        # full (Bp, 4H) vreg (2 EUP passes), then sliced per gate.
        sig = jax.nn.sigmoid(gates)
        tnh = jnp.tanh(gates)
        i_g = sig[:, 0 * H:1 * H]
        f_g = sig[:, 1 * H:2 * H]
        g_g = tnh[:, 2 * H:3 * H]
        o_g = sig[:, 3 * H:4 * H]
        c_new = f_g * c_prev + i_g * g_g
        h_new = o_g * jnp.tanh(c_new)
        return h_new, c_new

    def kernel(*refs):
        idx = 0
        x2d_ref = refs[idx]; idx += 1                     # (T*Bp, Din)
        wih0_ref = refs[idx]; idx += 1                    # (Din, 4H)
        whh0_ref = refs[idx]; idx += 1                    # (H, 4H)
        b0_ref = refs[idx]; idx += 1                      # (1, 4H)  b_ih+b_hh layer 0
        wcat_refs = refs[idx:idx + (L - 1)]; idx += L - 1  # (2H, 4H) per upper layer
        bup_refs = refs[idx:idx + (L - 1)]; idx += L - 1   # (1, 4H)  per upper layer
        h0_ref = refs[idx]; idx += 1                      # (L, Bp, H)
        c0_ref = refs[idx]; idx += 1                      # (L, Bp, H)
        fc1w_ref = refs[idx]; idx += 1                    # (H, F1)
        fc1b_ref = refs[idx]; idx += 1                    # (1, F1)
        fc2w_ref = refs[idx]; idx += 1                    # (1, F1) fc2 weight row
        fc2b_ref = refs[idx]; idx += 1                    # (1,) SMEM scalar
        y_ref = refs[idx]; idx += 1                       # (Bp, 1)
        state_ref = refs[idx]; idx += 1                   # (Bp, 2*L*H) packed hn|cn
        xg_sc = refs[idx]; idx += 1                       # VMEM (T, Bp, 4H)

        # ---- one-time prologue -------------------------------------------
        # Layer-0 input projection for ALL timesteps as a single GEMM, bias
        # folded in; stored 3-D so the loop indexes it with a plain xg_sc[t].
        xg = (jnp.dot(x2d_ref[...], wih0_ref[...],
                      preferred_element_type=jnp.float32) + b0_ref[...])
        xg_sc[...] = xg.reshape(T, Bp, 4 * H)

        # Hoist weight loads / bias broadcasts out of the serial time loop.
        whh0 = whh0_ref[...]
        wcat = [wcat_refs[i][...] for i in range(L - 1)]
        b_up = [jnp.broadcast_to(bup_refs[i][...], (Bp, 4 * H)) for i in range(L - 1)]

        h_init = tuple(h0_ref[l].astype(jnp.float32) for l in range(L))
        c_init = tuple(c0_ref[l].astype(jnp.float32) for l in range(L))

        def step(t, carry):
            hs, cs = carry
            hs, cs = list(hs), list(cs)
            # Layer 0: x-contribution precomputed -> only the recurrent matmul.
            gates = xg_sc[t] + jnp.dot(hs[0], whh0,
                                       preferred_element_type=jnp.float32)
            hs[0], cs[0] = cell(gates, cs[0])
            # Upper layers: single fused matmul on concat([h_below | h_self]).
            for l in range(1, L):
                hin = jnp.concatenate([hs[l - 1], hs[l]], axis=-1)  # (Bp, 2H)
                gates = (jnp.dot(hin, wcat[l - 1],
                                 preferred_element_type=jnp.float32)
                         + b_up[l - 1])
                hs[l], cs[l] = cell(gates, cs[l])
            return tuple(hs), tuple(cs)

        # Fully unroll at small T/H; partial unroll for big shapes so the
        # hoisted weights + unrolled body don't spill the 64-vreg file.
        unroll = True if (T <= 16 and H <= 64) else 4
        hs, cs = lax.fori_loop(0, T, step, (h_init, c_init), unroll=unroll)

        # ---- epilogue: packed lane-dense final state + fc head -----------
        state_ref[...] = jnp.concatenate(list(hs) + list(cs),
                                         axis=-1).astype(state_ref.dtype)

        h1 = jnp.tanh(
            jnp.dot(hs[L - 1], fc1w_ref[...], preferred_element_type=jnp.float32)
            + fc1b_ref[...])
        # fc2 has a single output feature: VPU multiply + lane reduction.
        y = jnp.sum(h1 * fc2w_ref[...], axis=-1, keepdims=True) + fc2b_ref[0]
        y_ref[...] = y.astype(y_ref.dtype)

    return kernel


# ---------------------------------------------------------------------------
# Wrapper (mirrors ExportWrapper.forward: returns (y, hn, cn))
# ---------------------------------------------------------------------------
def export_wrapper_forward(params, x, h0, c0):
    B, T, Din = x.shape
    L, _, H = h0.shape
    F1 = params["fc1_w"].shape[1]
    Bp = max(8, ((B + 7) // 8) * 8)          # pad batch to a sublane multiple

    # Time-major, batch-padded, flattened so the layer-0 projection is one GEMM.
    x_tm = jnp.transpose(x, (1, 0, 2))                        # (T, B, Din)
    x_tm = jnp.pad(x_tm, ((0, 0), (0, Bp - B), (0, 0)))
    x2d = x_tm.reshape(T * Bp, Din)

    h0_p = jnp.pad(h0, ((0, 0), (0, Bp - B), (0, 0)))
    c0_p = jnp.pad(c0, ((0, 0), (0, Bp - B), (0, 0)))

    # Layer 0 weights stay separate (input projection precomputed in prologue);
    # upper layers get [W_ih^T ; W_hh^T] pre-concatenated -> one dot per cell.
    wih0, whh0, b0 = params["lstm"][0]
    wcat = [jnp.concatenate([params["lstm"][l][0], params["lstm"][l][1]], axis=0)
            for l in range(1, L)]
    b_up = [params["lstm"][l][2] for l in range(1, L)]
    fc2_w_row = params["fc2_w"].reshape(1, F1)
    fc2_b_1d = params["fc2_b"].reshape(1)

    vmem = lambda: pl.BlockSpec(memory_space=pltpu.MemorySpace.VMEM)
    smem = lambda: pl.BlockSpec(memory_space=pltpu.MemorySpace.SMEM)
    in_specs = ([vmem()]                       # x2d
                + [vmem(), vmem(), vmem()]     # wih0, whh0, b0
                + [vmem()] * (L - 1)           # concatenated upper weights
                + [vmem()] * (L - 1)           # upper biases
                + [vmem(), vmem()]             # h0, c0
                + [vmem(), vmem(), vmem()]     # fc1_w, fc1_b, fc2_w_row
                + [smem()])                    # fc2_b (1,) scalar

    out_shape = (
        jax.ShapeDtypeStruct((Bp, 1), jnp.float32),            # y (padded batch)
        jax.ShapeDtypeStruct((Bp, 2 * L * H), jnp.float32),    # packed [hn | cn]
    )
    out_specs = (vmem(), vmem())

    kernel = _make_fused_kernel(L, T, Bp, H)
    y_p, state_p = pl.pallas_call(
        kernel,
        out_shape=out_shape,
        in_specs=in_specs,
        out_specs=out_specs,
        scratch_shapes=[pltpu.VMEM((T, Bp, 4 * H), jnp.float32)],
    )(x2d, wih0, whh0, b0, *wcat, *b_up, h0_p, c0_p,
      params["fc1_w"], params["fc1_b"], fc2_w_row, fc2_b_1d)

    # Unpack lane-dense state and slice batch padding back off.
    y = y_p[:B]
    hn = state_p[:B, :L * H].reshape(B, L, H).transpose(1, 0, 2)
    cn = state_p[:B, L * H:].reshape(B, L, H).transpose(1, 0, 2)
    return y, hn, cn


export_wrapper_forward_jit = jax.jit(export_wrapper_forward)


# ---------------------------------------------------------------------------
# Pure-JAX reference (for correctness check)
# ---------------------------------------------------------------------------
def ref_forward(params, x, h0, c0):
    B, T, _ = x.shape
    L = h0.shape[0]
    inp = x
    hns, cns = [], []
    for l in range(L):
        w_ih_t, w_hh_t, b = params["lstm"][l]
        h, c = h0[l], c0[l]
        H = h.shape[-1]
        outs = []
        for t in range(T):
            gates = inp[:, t, :] @ w_ih_t + h @ w_hh_t + b
            i = jax.nn.sigmoid(gates[:, :H])
            f = jax.nn.sigmoid(gates[:, H:2 * H])
            g = jnp.tanh(gates[:, 2 * H:3 * H])
            o = jax.nn.sigmoid(gates[:, 3 * H:])
            c = f * c + i * g
            h = o * jnp.tanh(c)
            outs.append(h)
        inp = jnp.stack(outs, axis=1)
        hns.append(h)
        cns.append(c)
    last = inp[:, -1, :]
    y = jnp.tanh(last @ params["fc1_w"] + params["fc1_b"]) @ params["fc2_w"] + params["fc2_b"]
    return y, jnp.stack(hns), jnp.stack(cns)


# ---------------------------------------------------------------------------
# Main
# ---------------------------------------------------------------------------
if __name__ == "__main__":
    # Small shapes consistent with the module (fc2 out-features = 1; squeeze(-1)).
    B, T, Din, H, L, F1 = 2, 8, 4, 32, 2, 32

    key = jax.random.PRNGKey(0)
    ks = jax.random.split(key, 4 * L + 5)

    params = {"lstm": []}
    ki = 0
    in_dim = Din
    for l in range(L):
        # stored pre-transposed: W_ih^T (in_dim,4H), W_hh^T (H,4H), combined bias (1,4H)
        w_ih_t = 0.1 * jax.random.normal(ks[ki], (in_dim, 4 * H), jnp.float32); ki += 1
        w_hh_t = 0.1 * jax.random.normal(ks[ki], (H, 4 * H), jnp.float32); ki += 1
        b_ih = 0.1 * jax.random.normal(ks[ki], (1, 4 * H), jnp.float32); ki += 1
        b_hh = 0.1 * jax.random.normal(ks[ki], (1, 4 * H), jnp.float32); ki += 1
        params["lstm"].append((w_ih_t, w_hh_t, b_ih + b_hh))
        in_dim = H

    params["fc1_w"] = 0.1 * jax.random.normal(ks[ki], (H, F1), jnp.float32); ki += 1
    params["fc1_b"] = 0.1 * jax.random.normal(ks[ki], (1, F1), jnp.float32); ki += 1
    params["fc2_w"] = 0.1 * jax.random.normal(ks[ki], (F1, 1), jnp.float32); ki += 1
    params["fc2_b"] = 0.1 * jax.random.normal(ks[ki], (1, 1), jnp.float32); ki += 1

    x = jax.random.normal(ks[ki], (B, T, Din), jnp.float32)
    h0 = jnp.zeros((L, B, H), jnp.float32)
    c0 = jnp.zeros((L, B, H), jnp.float32)

    y, hn, cn = export_wrapper_forward_jit(params, x, h0, c0)
    jax.block_until_ready((y, hn, cn))

    y_r, hn_r, cn_r = ref_forward(params, x, h0, c0)
    np.testing.assert_allclose(np.asarray(y), np.asarray(y_r), rtol=1e-5, atol=1e-5)
    np.testing.assert_allclose(np.asarray(hn), np.asarray(hn_r), rtol=1e-5, atol=1e-5)
    np.testing.assert_allclose(np.asarray(cn), np.asarray(cn_r), rtol=1e-5, atol=1e-5)

    assert y.shape == (B, 1) and hn.shape == (L, B, H) and cn.shape == (L, B, H)
    print("KERNEL_OK")
</pallas_src>

<mosaic_0001>
module attributes {stable_mosaic.version = 11 : i64} {
  func.func @kernel(%arg0: memref<64x4xf32, #tpu.memory_space<vmem>>, %arg1: memref<4x128xf32, #tpu.memory_space<vmem>>, %arg2: memref<32x128xf32, #tpu.memory_space<vmem>>, %arg3: memref<1x128xf32, #tpu.memory_space<vmem>>, %arg4: memref<64x128xf32, #tpu.memory_space<vmem>>, %arg5: memref<1x128xf32, #tpu.memory_space<vmem>>, %arg6: memref<2x8x32xf32, #tpu.memory_space<vmem>>, %arg7: memref<2x8x32xf32, #tpu.memory_space<vmem>>, %arg8: memref<32x32xf32, #tpu.memory_space<vmem>>, %arg9: memref<1x32xf32, #tpu.memory_space<vmem>>, %arg10: memref<1x32xf32, #tpu.memory_space<vmem>>, %arg11: memref<1xf32, #tpu.memory_space<smem>>, %arg12: memref<8x1xf32, #tpu.memory_space<vmem>>, %arg13: memref<8x128xf32, #tpu.memory_space<vmem>>, %arg14: memref<8x8x128xf32, #tpu.memory_space<vmem>>) attributes {dimension_semantics = [], scalar_prefetch = 0 : i64, scratch_operands = 1 : i64, tpu.core_type = #tpu.core_type<tc>} {
    %c0 = arith.constant 0 : index
    %c0_0 = arith.constant 0 : index
    %0 = vector.load %arg0[%c0, %c0_0] : memref<64x4xf32, #tpu.memory_space<vmem>>, vector<64x4xf32>
    %c0_1 = arith.constant 0 : index
    %c0_2 = arith.constant 0 : index
    %1 = vector.load %arg1[%c0_1, %c0_2] : memref<4x128xf32, #tpu.memory_space<vmem>>, vector<4x128xf32>
    %cst = arith.constant dense<0.000000e+00> : vector<64x128xf32>
    %2 = tpu.matmul %0, %1, %cst {dimension_numbers = #tpu.dot_dimension_numbers<[1], [0], [0], [1], [0, 0, 1, 1], [], []>} : vector<64x4xf32>, vector<4x128xf32>, vector<64x128xf32> -> vector<64x128xf32>
    %c0_3 = arith.constant 0 : index
    %c0_4 = arith.constant 0 : index
    %3 = vector.load %arg3[%c0_3, %c0_4] : memref<1x128xf32, #tpu.memory_space<vmem>>, vector<1x128xf32>
    %4 = vector.broadcast %3 : vector<1x128xf32> to vector<64x128xf32>
    %5 = arith.addf %2, %4 : vector<64x128xf32>
    %6 = vector.shape_cast %5 : vector<64x128xf32> to vector<8x8x128xf32>
    %c0_5 = arith.constant 0 : index
    %c0_6 = arith.constant 0 : index
    %c0_7 = arith.constant 0 : index
    %7 = vector.load %arg14[%c0_5, %c0_6, %c0_7] : memref<8x8x128xf32, #tpu.memory_space<vmem>>, vector<8x8x128xf32>
    tpu.vector_store %arg14[%c0_5, %c0_6, %c0_7], %6 {strides = array<i32>} : memref<8x8x128xf32, #tpu.memory_space<vmem>>, vector<8x8x128xf32>,
    %c0_8 = arith.constant 0 : index
    %c0_9 = arith.constant 0 : index
    %8 = vector.load %arg2[%c0_8, %c0_9] : memref<32x128xf32, #tpu.memory_space<vmem>>, vector<32x128xf32>
    %c0_10 = arith.constant 0 : index
    %c0_11 = arith.constant 0 : index
    %9 = vector.load %arg4[%c0_10, %c0_11] : memref<64x128xf32, #tpu.memory_space<vmem>>, vector<64x128xf32>
    %c0_12 = arith.constant 0 : index
    %c0_13 = arith.constant 0 : index
    %10 = vector.load %arg5[%c0_12, %c0_13] : memref<1x128xf32, #tpu.memory_space<vmem>>, vector<1x128xf32>
    %11 = vector.shape_cast %10 : vector<1x128xf32> to vector<1x128xf32>
    %12 = vector.broadcast %11 : vector<1x128xf32> to vector<8x128xf32>
    %c0_14 = arith.constant 0 : index
    %c0_15 = arith.constant 0 : index
    %c0_16 = arith.constant 0 : index
    %13 = vector.load %arg6[%c0_14, %c0_15, %c0_16] : memref<2x8x32xf32, #tpu.memory_space<vmem>>, vector<1x8x32xf32>
    %14 = vector.shape_cast %13 : vector<1x8x32xf32> to vector<8x32xf32>
    %c1 = arith.constant 1 : index
    %c0_17 = arith.constant 0 : index
    %c0_18 = arith.constant 0 : index
    %15 = vector.load %arg6[%c1, %c0_17, %c0_18] : memref<2x8x32xf32, #tpu.memory_space<vmem>>, vector<1x8x32xf32>
    %16 = vector.shape_cast %15 : vector<1x8x32xf32> to vector<8x32xf32>
    %c0_19 = arith.constant 0 : index
    %c0_20 = arith.constant 0 : index
    %c0_21 = arith.constant 0 : index
    %17 = vector.load %arg7[%c0_19, %c0_20, %c0_21] : memref<2x8x32xf32, #tpu.memory_space<vmem>>, vector<1x8x32xf32>
    %18 = vector.shape_cast %17 : vector<1x8x32xf32> to vector<8x32xf32>
    %c1_22 = arith.constant 1 : index
    %c0_23 = arith.constant 0 : index
    %c0_24 = arith.constant 0 : index
    %19 = vector.load %arg7[%c1_22, %c0_23, %c0_24] : memref<2x8x32xf32, #tpu.memory_space<vmem>>, vector<1x8x32xf32>
    %20 = vector.shape_cast %19 : vector<1x8x32xf32> to vector<8x32xf32>
    %c0_i32 = arith.constant 0 : i32
    %21 = arith.index_cast %c0_i32 : i32 to index
    %c0_25 = arith.constant 0 : index
    %c0_26 = arith.constant 0 : index
    %22 = vector.load %arg14[%21, %c0_25, %c0_26] : memref<8x8x128xf32, #tpu.memory_space<vmem>>, vector<1x8x128xf32>
    %23 = vector.shape_cast %22 : vector<1x8x128xf32> to vector<8x128xf32>
    %cst_27 = arith.constant dense<0.000000e+00> : vector<8x128xf32>
    %24 = tpu.matmul %14, %8, %cst_27 {dimension_numbers = #tpu.dot_dimension_numbers<[1], [0], [0], [1], [0, 0, 1, 1], [], []>} : vector<8x32xf32>, vector<32x128xf32>, vector<8x128xf32> -> vector<8x128xf32>
    %25 = arith.addf %23, %24 : vector<8x128xf32>
    %26 = arith.negf %25 : vector<8x128xf32>
    %27 = math.exp %26 : vector<8x128xf32>
    %cst_28 = arith.constant 1.000000e+00 : f32
    %28 = vector.broadcast %cst_28 : f32 to vector<8x128xf32>
    %29 = arith.addf %28, %27 : vector<8x128xf32>
    %30 = arith.divf %28, %29 : vector<8x128xf32>
    %31 = math.tanh %25 : vector<8x128xf32>
    %32 = vector.extract_strided_slice %30 {offsets = [0, 0], sizes = [8, 32], strides = [1, 1]} : vector<8x128xf32> to vector<8x32xf32>
    %33 = vector.extract_strided_slice %30 {offsets = [0, 32], sizes = [8, 32], strides = [1, 1]} : vector<8x128xf32> to vector<8x32xf32>
    %34 = vector.extract_strided_slice %31 {offsets = [0, 64], sizes = [8, 32], strides = [1, 1]} : vector<8x128xf32> to vector<8x32xf32>
    %35 = vector.extract_strided_slice %30 {offsets = [0, 96], sizes = [8, 32], strides = [1, 1]} : vector<8x128xf32> to vector<8x32xf32>
    %36 = arith.mulf %33, %18 : vector<8x32xf32>
    %37 = arith.mulf %32, %34 : vector<8x32xf32>
    %38 = arith.addf %36, %37 : vector<8x32xf32>
    %39 = math.tanh %38 : vector<8x32xf32>
    %40 = arith.mulf %35, %39 : vector<8x32xf32>
    %41 = tpu.concatenate %40, %16 in 1 : vector<8x32xf32>, vector<8x32xf32> -> vector<8x64xf32>
    %cst_29 = arith.constant dense<0.000000e+00> : vector<8x128xf32>
    %42 = tpu.matmul %41, %9, %cst_29 {dimension_numbers = #tpu.dot_dimension_numbers<[1], [0], [0], [1], [0, 0, 1, 1], [], []>} : vector<8x64xf32>, vector<64x128xf32>, vector<8x128xf32> -> vector<8x128xf32>
    %43 = arith.addf %42, %12 : vector<8x128xf32>
    %44 = arith.negf %43 : vector<8x128xf32>
    %45 = math.exp %44 : vector<8x128xf32>
    %cst_30 = arith.constant 1.000000e+00 : f32
    %46 = vector.broadcast %cst_30 : f32 to vector<8x128xf32>
    %47 = arith.addf %46, %45 : vector<8x128xf32>
    %48 = arith.divf %46, %47 : vector<8x128xf32>
    %49 = math.tanh %43 : vector<8x128xf32>
    %50 = vector.extract_strided_slice %48 {offsets = [0, 0], sizes = [8, 32], strides = [1, 1]} : vector<8x128xf32> to vector<8x32xf32>
    %51 = vector.extract_strided_slice %48 {offsets = [0, 32], sizes = [8, 32], strides = [1, 1]} : vector<8x128xf32> to vector<8x32xf32>
    %52 = vector.extract_strided_slice %49 {offsets = [0, 64], sizes = [8, 32], strides = [1, 1]} : vector<8x128xf32> to vector<8x32xf32>
    %53 = vector.extract_strided_slice %48 {offsets = [0, 96], sizes = [8, 32], strides = [1, 1]} : vector<8x128xf32> to vector<8x32xf32>
    %54 = arith.mulf %51, %20 : vector<8x32xf32>
    %55 = arith.mulf %50, %52 : vector<8x32xf32>
    %56 = arith.addf %54, %55 : vector<8x32xf32>
    %57 = math.tanh %56 : vector<8x32xf32>
    %58 = arith.mulf %53, %57 : vector<8x32xf32>
    %c1_i32 = arith.constant 1 : i32
    %59 = arith.index_cast %c1_i32 : i32 to index
    %c0_31 = arith.constant 0 : index
    %c0_32 = arith.constant 0 : index
    %60 = vector.load %arg14[%59, %c0_31, %c0_32] : memref<8x8x128xf32, #tpu.memory_space<vmem>>, vector<1x8x128xf32>
    %61 = vector.shape_cast %60 : vector<1x8x128xf32> to vector<8x128xf32>
    %cst_33 = arith.constant dense<0.000000e+00> : vector<8x128xf32>
    %62 = tpu.matmul %40, %8, %cst_33 {dimension_numbers = #tpu.dot_dimension_numbers<[1], [0], [0], [1], [0, 0, 1, 1], [], []>} : vector<8x32xf32>, vector<32x128xf32>, vector<8x128xf32> -> vector<8x128xf32>
    %63 = arith.addf %61, %62 : vector<8x128xf32>
    %64 = arith.negf %63 : vector<8x128xf32>
    %65 = math.exp %64 : vector<8x128xf32>
    %cst_34 = arith.constant 1.000000e+00 : f32
    %66 = vector.broadcast %cst_34 : f32 to vector<8x128xf32>
    %67 = arith.addf %66, %65 : vector<8x128xf32>
    %68 = arith.divf %66, %67 : vector<8x128xf32>
    %69 = math.tanh %63 : vector<8x128xf32>
    %70 = vector.extract_strided_slice %68 {offsets = [0, 0], sizes = [8, 32], strides = [1, 1]} : vector<8x128xf32> to vector<8x32xf32>
    %71 = vector.extract_strided_slice %68 {offsets = [0, 32], sizes = [8, 32], strides = [1, 1]} : vector<8x128xf32> to vector<8x32xf32>
    %72 = vector.extract_strided_slice %69 {offsets = [0, 64], sizes = [8, 32], strides = [1, 1]} : vector<8x128xf32> to vector<8x32xf32>
    %73 = vector.extract_strided_slice %68 {offsets = [0, 96], sizes = [8, 32], strides = [1, 1]} : vector<8x128xf32> to vector<8x32xf32>
    %74 = arith.mulf %71, %38 : vector<8x32xf32>
    %75 = arith.mulf %70, %72 : vector<8x32xf32>
    %76 = arith.addf %74, %75 : vector<8x32xf32>
    %77 = math.tanh %76 : vector<8x32xf32>
    %78 = arith.mulf %73, %77 : vector<8x32xf32>
    %79 = tpu.concatenate %78, %58 in 1 : vector<8x32xf32>, vector<8x32xf32> -> vector<8x64xf32>
    %cst_35 = arith.constant dense<0.000000e+00> : vector<8x128xf32>
    %80 = tpu.matmul %79, %9, %cst_35 {dimension_numbers = #tpu.dot_dimension_numbers<[1], [0], [0], [1], [0, 0, 1, 1], [], []>} : vector<8x64xf32>, vector<64x128xf32>, vector<8x128xf32> -> vector<8x128xf32>
    %81 = arith.addf %80, %12 : vector<8x128xf32>
    %82 = arith.negf %81 : vector<8x128xf32>
    %83 = math.exp %82 : vector<8x128xf32>
    %cst_36 = arith.constant 1.000000e+00 : f32
    %84 = vector.broadcast %cst_36 : f32 to vector<8x128xf32>
    %85 = arith.addf %84, %83 : vector<8x128xf32>
    %86 = arith.divf %84, %85 : vector<8x128xf32>
    %87 = math.tanh %81 : vector<8x128xf32>
    %88 = vector.extract_strided_slice %86 {offsets = [0, 0], sizes = [8, 32], strides = [1, 1]} : vector<8x128xf32> to vector<8x32xf32>
    %89 = vector.extract_strided_slice %86 {offsets = [0, 32], sizes = [8, 32], strides = [1, 1]} : vector<8x128xf32> to vector<8x32xf32>
    %90 = vector.extract_strided_slice %87 {offsets = [0, 64], sizes = [8, 32], strides = [1, 1]} : vector<8x128xf32> to vector<8x32xf32>
    %91 = vector.extract_strided_slice %86 {offsets = [0, 96], sizes = [8, 32], strides = [1, 1]} : vector<8x128xf32> to vector<8x32xf32>
    %92 = arith.mulf %89, %56 : vector<8x32xf32>
    %93 = arith.mulf %88, %90 : vector<8x32xf32>
    %94 = arith.addf %92, %93 : vector<8x32xf32>
    %95 = math.tanh %94 : vector<8x32xf32>
    %96 = arith.mulf %91, %95 : vector<8x32xf32>
    %c2_i32 = arith.constant 2 : i32
    %97 = arith.index_cast %c2_i32 : i32 to index
    %c0_37 = arith.constant 0 : index
    %c0_38 = arith.constant 0 : index
    %98 = vector.load %arg14[%97, %c0_37, %c0_38] : memref<8x8x128xf32, #tpu.memory_space<vmem>>, vector<1x8x128xf32>
    %99 = vector.shape_cast %98 : vector<1x8x128xf32> to vector<8x128xf32>
    %cst_39 = arith.constant dense<0.000000e+00> : vector<8x128xf32>
    %100 = tpu.matmul %78, %8, %cst_39 {dimension_numbers = #tpu.dot_dimension_numbers<[1], [0], [0], [1], [0, 0, 1, 1], [], []>} : vector<8x32xf32>, vector<32x128xf32>, vector<8x128xf32> -> vector<8x128xf32>
    %101 = arith.addf %99, %100 : vector<8x128xf32>
    %102 = arith.negf %101 : vector<8x128xf32>
    %103 = math.exp %102 : vector<8x128xf32>
    %cst_40 = arith.constant 1.000000e+00 : f32
    %104 = vector.broadcast %cst_40 : f32 to vector<8x128xf32>
    %105 = arith.addf %104, %103 : vector<8x128xf32>
    %106 = arith.divf %104, %105 : vector<8x128xf32>
    %107 = math.tanh %101 : vector<8x128xf32>
    %108 = vector.extract_strided_slice %106 {offsets = [0, 0], sizes = [8, 32], strides = [1, 1]} : vector<8x128xf32> to vector<8x32xf32>
    %109 = vector.extract_strided_slice %106 {offsets = [0, 32], sizes = [8, 32], strides = [1, 1]} : vector<8x128xf32> to vector<8x32xf32>
    %110 = vector.extract_strided_slice %107 {offsets = [0, 64], sizes = [8, 32], strides = [1, 1]} : vector<8x128xf32> to vector<8x32xf32>
    %111 = vector.extract_strided_slice %106 {offsets = [0, 96], sizes = [8, 32], strides = [1, 1]} : vector<8x128xf32> to vector<8x32xf32>
    %112 = arith.mulf %109, %76 : vector<8x32xf32>
    %113 = arith.mulf %108, %110 : vector<8x32xf32>
    %114 = arith.addf %112, %113 : vector<8x32xf32>
    %115 = math.tanh %114 : vector<8x32xf32>
    %116 = arith.mulf %111, %115 : vector<8x32xf32>
    %117 = tpu.concatenate %116, %96 in 1 : vector<8x32xf32>, vector<8x32xf32> -> vector<8x64xf32>
    %cst_41 = arith.constant dense<0.000000e+00> : vector<8x128xf32>
    %118 = tpu.matmul %117, %9, %cst_41 {dimension_numbers = #tpu.dot_dimension_numbers<[1], [0], [0], [1], [0, 0, 1, 1], [], []>} : vector<8x64xf32>, vector<64x128xf32>, vector<8x128xf32> -> vector<8x128xf32>
    %119 = arith.addf %118, %12 : vector<8x128xf32>
    %120 = arith.negf %119 : vector<8x128xf32>
    %121 = math.exp %120 : vector<8x128xf32>
    %cst_42 = arith.constant 1.000000e+00 : f32
    %122 = vector.broadcast %cst_42 : f32 to vector<8x128xf32>
    %123 = arith.addf %122, %121 : vector<8x128xf32>
    %124 = arith.divf %122, %123 : vector<8x128xf32>
    %125 = math.tanh %119 : vector<8x128xf32>
    %126 = vector.extract_strided_slice %124 {offsets = [0, 0], sizes = [8, 32], strides = [1, 1]} : vector<8x128xf32> to vector<8x32xf32>
    %127 = vector.extract_strided_slice %124 {offsets = [0, 32], sizes = [8, 32], strides = [1, 1]} : vector<8x128xf32> to vector<8x32xf32>
    %128 = vector.extract_strided_slice %125 {offsets = [0, 64], sizes = [8, 32], strides = [1, 1]} : vector<8x128xf32> to vector<8x32xf32>
    %129 = vector.extract_strided_slice %124 {offsets = [0, 96], sizes = [8, 32], strides = [1, 1]} : vector<8x128xf32> to vector<8x32xf32>
    %130 = arith.mulf %127, %94 : vector<8x32xf32>
    %131 = arith.mulf %126, %128 : vector<8x32xf32>
    %132 = arith.addf %130, %131 : vector<8x32xf32>
    %133 = math.tanh %132 : vector<8x32xf32>
    %134 = arith.mulf %129, %133 : vector<8x32xf32>
    %c3_i32 = arith.constant 3 : i32
    %135 = arith.index_cast %c3_i32 : i32 to index
    %c0_43 = arith.constant 0 : index
    %c0_44 = arith.constant 0 : index
    %136 = vector.load %arg14[%135, %c0_43, %c0_44] : memref<8x8x128xf32, #tpu.memory_space<vmem>>, vector<1x8x128xf32>
    %137 = vector.shape_cast %136 : vector<1x8x128xf32> to vector<8x128xf32>
    %cst_45 = arith.constant dense<0.000000e+00> : vector<8x128xf32>
    %138 = tpu.matmul %116, %8, %cst_45 {dimension_numbers = #tpu.dot_dimension_numbers<[1], [0], [0], [1], [0, 0, 1, 1], [], []>} : vector<8x32xf32>, vector<32x128xf32>, vector<8x128xf32> -> vector<8x128xf32>
    %139 = arith.addf %137, %138 : vector<8x128xf32>
    %140 = arith.negf %139 : vector<8x128xf32>
    %141 = math.exp %140 : vector<8x128xf32>
    %cst_46 = arith.constant 1.000000e+00 : f32
    %142 = vector.broadcast %cst_46 : f32 to vector<8x128xf32>
    %143 = arith.addf %142, %141 : vector<8x128xf32>
    %144 = arith.divf %142, %143 : vector<8x128xf32>
    %145 = math.tanh %139 : vector<8x128xf32>
    %146 = vector.extract_strided_slice %144 {offsets = [0, 0], sizes = [8, 32], strides = [1, 1]} : vector<8x128xf32> to vector<8x32xf32>
    %147 = vector.extract_strided_slice %144 {offsets = [0, 32], sizes = [8, 32], strides = [1, 1]} : vector<8x128xf32> to vector<8x32xf32>
    %148 = vector.extract_strided_slice %145 {offsets = [0, 64], sizes = [8, 32], strides = [1, 1]} : vector<8x128xf32> to vector<8x32xf32>
    %149 = vector.extract_strided_slice %144 {offsets = [0, 96], sizes = [8, 32], strides = [1, 1]} : vector<8x128xf32> to vector<8x32xf32>
    %150 = arith.mulf %147, %114 : vector<8x32xf32>
    %151 = arith.mulf %146, %148 : vector<8x32xf32>
    %152 = arith.addf %150, %151 : vector<8x32xf32>
    %153 = math.tanh %152 : vector<8x32xf32>
    %154 = arith.mulf %149, %153 : vector<8x32xf32>
    %155 = tpu.concatenate %154, %134 in 1 : vector<8x32xf32>, vector<8x32xf32> -> vector<8x64xf32>
    %cst_47 = arith.constant dense<0.000000e+00> : vector<8x128xf32>
    %156 = tpu.matmul %155, %9, %cst_47 {dimension_numbers = #tpu.dot_dimension_numbers<[1], [0], [0], [1], [0, 0, 1, 1], [], []>} : vector<8x64xf32>, vector<64x128xf32>, vector<8x128xf32> -> vector<8x128xf32>
    %157 = arith.addf %156, %12 : vector<8x128xf32>
    %158 = arith.negf %157 : vector<8x128xf32>
    %159 = math.exp %158 : vector<8x128xf32>
    %cst_48 = arith.constant 1.000000e+00 : f32
    %160 = vector.broadcast %cst_48 : f32 to vector<8x128xf32>
    %161 = arith.addf %160, %159 : vector<8x128xf32>
    %162 = arith.divf %160, %161 : vector<8x128xf32>
    %163 = math.tanh %157 : vector<8x128xf32>
    %164 = vector.extract_strided_slice %162 {offsets = [0, 0], sizes = [8, 32], strides = [1, 1]} : vector<8x128xf32> to vector<8x32xf32>
    %165 = vector.extract_strided_slice %162 {offsets = [0, 32], sizes = [8, 32], strides = [1, 1]} : vector<8x128xf32> to vector<8x32xf32>
    %166 = vector.extract_strided_slice %163 {offsets = [0, 64], sizes = [8, 32], strides = [1, 1]} : vector<8x128xf32> to vector<8x32xf32>
    %167 = vector.extract_strided_slice %162 {offsets = [0, 96], sizes = [8, 32], strides = [1, 1]} : vector<8x128xf32> to vector<8x32xf32>
    %168 = arith.mulf %165, %132 : vector<8x32xf32>
    %169 = arith.mulf %164, %166 : vector<8x32xf32>
    %170 = arith.addf %168, %169 : vector<8x32xf32>
    %171 = math.tanh %170 : vector<8x32xf32>
    %172 = arith.mulf %167, %171 : vector<8x32xf32>
    %c4_i32 = arith.constant 4 : i32
    %173 = arith.index_cast %c4_i32 : i32 to index
    %c0_49 = arith.constant 0 : index
    %c0_50 = arith.constant 0 : index
    %174 = vector.load %arg14[%173, %c0_49, %c0_50] : memref<8x8x128xf32, #tpu.memory_space<vmem>>, vector<1x8x128xf32>
    %175 = vector.shape_cast %174 : vector<1x8x128xf32> to vector<8x128xf32>
    %cst_51 = arith.constant dense<0.000000e+00> : vector<8x128xf32>
    %176 = tpu.matmul %154, %8, %cst_51 {dimension_numbers = #tpu.dot_dimension_numbers<[1], [0], [0], [1], [0, 0, 1, 1], [], []>} : vector<8x32xf32>, vector<32x128xf32>, vector<8x128xf32> -> vector<8x128xf32>
    %177 = arith.addf %175, %176 : vector<8x128xf32>
    %178 = arith.negf %177 : vector<8x128xf32>
    %179 = math.exp %178 : vector<8x128xf32>
    %cst_52 = arith.constant 1.000000e+00 : f32
    %180 = vector.broadcast %cst_52 : f32 to vector<8x128xf32>
    %181 = arith.addf %180, %179 : vector<8x128xf32>
    %182 = arith.divf %180, %181 : vector<8x128xf32>
    %183 = math.tanh %177 : vector<8x128xf32>
    %184 = vector.extract_strided_slice %182 {offsets = [0, 0], sizes = [8, 32], strides = [1, 1]} : vector<8x128xf32> to vector<8x32xf32>
    %185 = vector.extract_strided_slice %182 {offsets = [0, 32], sizes = [8, 32], strides = [1, 1]} : vector<8x128xf32> to vector<8x32xf32>
    %186 = vector.extract_strided_slice %183 {offsets = [0, 64], sizes = [8, 32], strides = [1, 1]} : vector<8x128xf32> to vector<8x32xf32>
    %187 = vector.extract_strided_slice %182 {offsets = [0, 96], sizes = [8, 32], strides = [1, 1]} : vector<8x128xf32> to vector<8x32xf32>
    %188 = arith.mulf %185, %152 : vector<8x32xf32>
    %189 = arith.mulf %184, %186 : vector<8x32xf32>
    %190 = arith.addf %188, %189 : vector<8x32xf32>
    %191 = math.tanh %190 : vector<8x32xf32>
    %192 = arith.mulf %187, %191 : vector<8x32xf32>
    %193 = tpu.concatenate %192, %172 in 1 : vector<8x32xf32>, vector<8x32xf32> -> vector<8x64xf32>
    %cst_53 = arith.constant dense<0.000000e+00> : vector<8x128xf32>
    %194 = tpu.matmul %193, %9, %cst_53 {dimension_numbers = #tpu.dot_dimension_numbers<[1], [0], [0], [1], [0, 0, 1, 1], [], []>} : vector<8x64xf32>, vector<64x128xf32>, vector<8x128xf32> -> vector<8x128xf32>
    %195 = arith.addf %194, %12 : vector<8x128xf32>
    %196 = arith.negf %195 : vector<8x128xf32>
    %197 = math.exp %196 : vector<8x128xf32>
    %cst_54 = arith.constant 1.000000e+00 : f32
    %198 = vector.broadcast %cst_54 : f32 to vector<8x128xf32>
    %199 = arith.addf %198, %197 : vector<8x128xf32>
    %200 = arith.divf %198, %199 : vector<8x128xf32>
    %201 = math.tanh %195 : vector<8x128xf32>
    %202 = vector.extract_strided_slice %200 {offsets = [0, 0], sizes = [8, 32], strides = [1, 1]} : vector<8x128xf32> to vector<8x32xf32>
    %203 = vector.extract_strided_slice %200 {offsets = [0, 32], sizes = [8, 32], strides = [1, 1]} : vector<8x128xf32> to vector<8x32xf32>
    %204 = vector.extract_strided_slice %201 {offsets = [0, 64], sizes = [8, 32], strides = [1, 1]} : vector<8x128xf32> to vector<8x32xf32>
    %205 = vector.extract_strided_slice %200 {offsets = [0, 96], sizes = [8, 32], strides = [1, 1]} : vector<8x128xf32> to vector<8x32xf32>
    %206 = arith.mulf %203, %170 : vector<8x32xf32>
    %207 = arith.mulf %202, %204 : vector<8x32xf32>
    %208 = arith.addf %206, %207 : vector<8x32xf32>
    %209 = math.tanh %208 : vector<8x32xf32>
    %210 = arith.mulf %205, %209 : vector<8x32xf32>
    %c5_i32 = arith.constant 5 : i32
    %211 = arith.index_cast %c5_i32 : i32 to index
    %c0_55 = arith.constant 0 : index
    %c0_56 = arith.constant 0 : index
    %212 = vector.load %arg14[%211, %c0_55, %c0_56] : memref<8x8x128xf32, #tpu.memory_space<vmem>>, vector<1x8x128xf32>
    %213 = vector.shape_cast %212 : vector<1x8x128xf32> to vector<8x128xf32>
    %cst_57 = arith.constant dense<0.000000e+00> : vector<8x128xf32>
    %214 = tpu.matmul %192, %8, %cst_57 {dimension_numbers = #tpu.dot_dimension_numbers<[1], [0], [0], [1], [0, 0, 1, 1], [], []>} : vector<8x32xf32>, vector<32x128xf32>, vector<8x128xf32> -> vector<8x128xf32>
    %215 = arith.addf %213, %214 : vector<8x128xf32>
    %216 = arith.negf %215 : vector<8x128xf32>
    %217 = math.exp %216 : vector<8x128xf32>
    %cst_58 = arith.constant 1.000000e+00 : f32
    %218 = vector.broadcast %cst_58 : f32 to vector<8x128xf32>
    %219 = arith.addf %218, %217 : vector<8x128xf32>
    %220 = arith.divf %218, %219 : vector<8x128xf32>
    %221 = math.tanh %215 : vector<8x128xf32>
    %222 = vector.extract_strided_slice %220 {offsets = [0, 0], sizes = [8, 32], strides = [1, 1]} : vector<8x128xf32> to vector<8x32xf32>
    %223 = vector.extract_strided_slice %220 {offsets = [0, 32], sizes = [8, 32], strides = [1, 1]} : vector<8x128xf32> to vector<8x32xf32>
    %224 = vector.extract_strided_slice %221 {offsets = [0, 64], sizes = [8, 32], strides = [1, 1]} : vector<8x128xf32> to vector<8x32xf32>
    %225 = vector.extract_strided_slice %220 {offsets = [0, 96], sizes = [8, 32], strides = [1, 1]} : vector<8x128xf32> to vector<8x32xf32>
    %226 = arith.mulf %223, %190 : vector<8x32xf32>
    %227 = arith.mulf %222, %224 : vector<8x32xf32>
    %228 = arith.addf %226, %227 : vector<8x32xf32>
    %229 = math.tanh %228 : vector<8x32xf32>
    %230 = arith.mulf %225, %229 : vector<8x32xf32>
    %231 = tpu.concatenate %230, %210 in 1 : vector<8x32xf32>, vector<8x32xf32> -> vector<8x64xf32>
    %cst_59 = arith.constant dense<0.000000e+00> : vector<8x128xf32>
    %232 = tpu.matmul %231, %9, %cst_59 {dimension_numbers = #tpu.dot_dimension_numbers<[1], [0], [0], [1], [0, 0, 1, 1], [], []>} : vector<8x64xf32>, vector<64x128xf32>, vector<8x128xf32> -> vector<8x128xf32>
    %233 = arith.addf %232, %12 : vector<8x128xf32>
    %234 = arith.negf %233 : vector<8x128xf32>
    %235 = math.exp %234 : vector<8x128xf32>
    %cst_60 = arith.constant 1.000000e+00 : f32
    %236 = vector.broadcast %cst_60 : f32 to vector<8x128xf32>
    %237 = arith.addf %236, %235 : vector<8x128xf32>
    %238 = arith.divf %236, %237 : vector<8x128xf32>
    %239 = math.tanh %233 : vector<8x128xf32>
    %240 = vector.extract_strided_slice %238 {offsets = [0, 0], sizes = [8, 32], strides = [1, 1]} : vector<8x128xf32> to vector<8x32xf32>
    %241 = vector.extract_strided_slice %238 {offsets = [0, 32], sizes = [8, 32], strides = [1, 1]} : vector<8x128xf32> to vector<8x32xf32>
    %242 = vector.extract_strided_slice %239 {offsets = [0, 64], sizes = [8, 32], strides = [1, 1]} : vector<8x128xf32> to vector<8x32xf32>
    %243 = vector.extract_strided_slice %238 {offsets = [0, 96], sizes = [8, 32], strides = [1, 1]} : vector<8x128xf32> to vector<8x32xf32>
    %244 = arith.mulf %241, %208 : vector<8x32xf32>
    %245 = arith.mulf %240, %242 : vector<8x32xf32>
    %246 = arith.addf %244, %245 : vector<8x32xf32>
    %247 = math.tanh %246 : vector<8x32xf32>
    %248 = arith.mulf %243, %247 : vector<8x32xf32>
    %c6_i32 = arith.constant 6 : i32
    %249 = arith.index_cast %c6_i32 : i32 to index
    %c0_61 = arith.constant 0 : index
    %c0_62 = arith.constant 0 : index
    %250 = vector.load %arg14[%249, %c0_61, %c0_62] : memref<8x8x128xf32, #tpu.memory_space<vmem>>, vector<1x8x128xf32>
    %251 = vector.shape_cast %250 : vector<1x8x128xf32> to vector<8x128xf32>
    %cst_63 = arith.constant dense<0.000000e+00> : vector<8x128xf32>
    %252 = tpu.matmul %230, %8, %cst_63 {dimension_numbers = #tpu.dot_dimension_numbers<[1], [0], [0], [1], [0, 0, 1, 1], [], []>} : vector<8x32xf32>, vector<32x128xf32>, vector<8x128xf32> -> vector<8x128xf32>
    %253 = arith.addf %251, %252 : vector<8x128xf32>
    %254 = arith.negf %253 : vector<8x128xf32>
    %255 = math.exp %254 : vector<8x128xf32>
    %cst_64 = arith.constant 1.000000e+00 : f32
    %256 = vector.broadcast %cst_64 : f32 to vector<8x128xf32>
    %257 = arith.addf %256, %255 : vector<8x128xf32>
    %258 = arith.divf %256, %257 : vector<8x128xf32>
    %259 = math.tanh %253 : vector<8x128xf32>
    %260 = vector.extract_strided_slice %258 {offsets = [0, 0], sizes = [8, 32], strides = [1, 1]} : vector<8x128xf32> to vector<8x32xf32>
    %261 = vector.extract_strided_slice %258 {offsets = [0, 32], sizes = [8, 32], strides = [1, 1]} : vector<8x128xf32> to vector<8x32xf32>
    %262 = vector.extract_strided_slice %259 {offsets = [0, 64], sizes = [8, 32], strides = [1, 1]} : vector<8x128xf32> to vector<8x32xf32>
    %263 = vector.extract_strided_slice %258 {offsets = [0, 96], sizes = [8, 32], strides = [1, 1]} : vector<8x128xf32> to vector<8x32xf32>
    %264 = arith.mulf %261, %228 : vector<8x32xf32>
    %265 = arith.mulf %260, %262 : vector<8x32xf32>
    %266 = arith.addf %264, %265 : vector<8x32xf32>
    %267 = math.tanh %266 : vector<8x32xf32>
    %268 = arith.mulf %263, %267 : vector<8x32xf32>
    %269 = tpu.concatenate %268, %248 in 1 : vector<8x32xf32>, vector<8x32xf32> -> vector<8x64xf32>
    %cst_65 = arith.constant dense<0.000000e+00> : vector<8x128xf32>
    %270 = tpu.matmul %269, %9, %cst_65 {dimension_numbers = #tpu.dot_dimension_numbers<[1], [0], [0], [1], [0, 0, 1, 1], [], []>} : vector<8x64xf32>, vector<64x128xf32>, vector<8x128xf32> -> vector<8x128xf32>
    %271 = arith.addf %270, %12 : vector<8x128xf32>
    %272 = arith.negf %271 : vector<8x128xf32>
    %273 = math.exp %272 : vector<8x128xf32>
    %cst_66 = arith.constant 1.000000e+00 : f32
    %274 = vector.broadcast %cst_66 : f32 to vector<8x128xf32>
    %275 = arith.addf %274, %273 : vector<8x128xf32>
    %276 = arith.divf %274, %275 : vector<8x128xf32>
    %277 = math.tanh %271 : vector<8x128xf32>
    %278 = vector.extract_strided_slice %276 {offsets = [0, 0], sizes = [8, 32], strides = [1, 1]} : vector<8x128xf32> to vector<8x32xf32>
    %279 = vector.extract_strided_slice %276 {offsets = [0, 32], sizes = [8, 32], strides = [1, 1]} : vector<8x128xf32> to vector<8x32xf32>
    %280 = vector.extract_strided_slice %277 {offsets = [0, 64], sizes = [8, 32], strides = [1, 1]} : vector<8x128xf32> to vector<8x32xf32>
    %281 = vector.extract_strided_slice %276 {offsets = [0, 96], sizes = [8, 32], strides = [1, 1]} : vector<8x128xf32> to vector<8x32xf32>
    %282 = arith.mulf %279, %246 : vector<8x32xf32>
    %283 = arith.mulf %278, %280 : vector<8x32xf32>
    %284 = arith.addf %282, %283 : vector<8x32xf32>
    %285 = math.tanh %284 : vector<8x32xf32>
    %286 = arith.mulf %281, %285 : vector<8x32xf32>
    %c7_i32 = arith.constant 7 : i32
    %287 = arith.index_cast %c7_i32 : i32 to index
    %c0_67 = arith.constant 0 : index
    %c0_68 = arith.constant 0 : index
    %288 = vector.load %arg14[%287, %c0_67, %c0_68] : memref<8x8x128xf32, #tpu.memory_space<vmem>>, vector<1x8x128xf32>
    %289 = vector.shape_cast %288 : vector<1x8x128xf32> to vector<8x128xf32>
    %cst_69 = arith.constant dense<0.000000e+00> : vector<8x128xf32>
    %290 = tpu.matmul %268, %8, %cst_69 {dimension_numbers = #tpu.dot_dimension_numbers<[1], [0], [0], [1], [0, 0, 1, 1], [], []>} : vector<8x32xf32>, vector<32x128xf32>, vector<8x128xf32> -> vector<8x128xf32>
    %291 = arith.addf %289, %290 : vector<8x128xf32>
    %292 = arith.negf %291 : vector<8x128xf32>
    %293 = math.exp %292 : vector<8x128xf32>
    %cst_70 = arith.constant 1.000000e+00 : f32
    %294 = vector.broadcast %cst_70 : f32 to vector<8x128xf32>
    %295 = arith.addf %294, %293 : vector<8x128xf32>
    %296 = arith.divf %294, %295 : vector<8x128xf32>
    %297 = math.tanh %291 : vector<8x128xf32>
    %298 = vector.extract_strided_slice %296 {offsets = [0, 0], sizes = [8, 32], strides = [1, 1]} : vector<8x128xf32> to vector<8x32xf32>
    %299 = vector.extract_strided_slice %296 {offsets = [0, 32], sizes = [8, 32], strides = [1, 1]} : vector<8x128xf32> to vector<8x32xf32>
    %300 = vector.extract_strided_slice %297 {offsets = [0, 64], sizes = [8, 32], strides = [1, 1]} : vector<8x128xf32> to vector<8x32xf32>
    %301 = vector.extract_strided_slice %296 {offsets = [0, 96], sizes = [8, 32], strides = [1, 1]} : vector<8x128xf32> to vector<8x32xf32>
    %302 = arith.mulf %299, %266 : vector<8x32xf32>
    %303 = arith.mulf %298, %300 : vector<8x32xf32>
    %304 = arith.addf %302, %303 : vector<8x32xf32>
    %305 = math.tanh %304 : vector<8x32xf32>
    %306 = arith.mulf %301, %305 : vector<8x32xf32>
    %307 = tpu.concatenate %306, %286 in 1 : vector<8x32xf32>, vector<8x32xf32> -> vector<8x64xf32>
    %cst_71 = arith.constant dense<0.000000e+00> : vector<8x128xf32>
    %308 = tpu.matmul %307, %9, %cst_71 {dimension_numbers = #tpu.dot_dimension_numbers<[1], [0], [0], [1], [0, 0, 1, 1], [], []>} : vector<8x64xf32>, vector<64x128xf32>, vector<8x128xf32> -> vector<8x128xf32>
    %309 = arith.addf %308, %12 : vector<8x128xf32>
    %310 = arith.negf %309 : vector<8x128xf32>
    %311 = math.exp %310 : vector<8x128xf32>
    %cst_72 = arith.constant 1.000000e+00 : f32
    %312 = vector.broadcast %cst_72 : f32 to vector<8x128xf32>
    %313 = arith.addf %312, %311 : vector<8x128xf32>
    %314 = arith.divf %312, %313 : vector<8x128xf32>
    %315 = math.tanh %309 : vector<8x128xf32>
    %316 = vector.extract_strided_slice %314 {offsets = [0, 0], sizes = [8, 32], strides = [1, 1]} : vector<8x128xf32> to vector<8x32xf32>
    %317 = vector.extract_strided_slice %314 {offsets = [0, 32], sizes = [8, 32], strides = [1, 1]} : vector<8x128xf32> to vector<8x32xf32>
    %318 = vector.extract_strided_slice %315 {offsets = [0, 64], sizes = [8, 32], strides = [1, 1]} : vector<8x128xf32> to vector<8x32xf32>
    %319 = vector.extract_strided_slice %314 {offsets = [0, 96], sizes = [8, 32], strides = [1, 1]} : vector<8x128xf32> to vector<8x32xf32>
    %320 = arith.mulf %317, %284 : vector<8x32xf32>
    %321 = arith.mulf %316, %318 : vector<8x32xf32>
    %322 = arith.addf %320, %321 : vector<8x32xf32>
    %323 = math.tanh %322 : vector<8x32xf32>
    %324 = arith.mulf %319, %323 : vector<8x32xf32>
    %c8_i32 = arith.constant 8 : i32
    %325 = tpu.concatenate %306, %324, %304, %322 in 1 : vector<8x32xf32>, vector<8x32xf32>, vector<8x32xf32>, vector<8x32xf32> -> vector<8x128xf32>
    %c0_73 = arith.constant 0 : index
    %c0_74 = arith.constant 0 : index
    %326 = vector.load %arg13[%c0_73, %c0_74] : memref<8x128xf32, #tpu.memory_space<vmem>>, vector<8x128xf32>
    tpu.vector_store %arg13[%c0_73, %c0_74], %325 {strides = array<i32>} : memref<8x128xf32, #tpu.memory_space<vmem>>, vector<8x128xf32>,
    %c0_75 = arith.constant 0 : index
    %c0_76 = arith.constant 0 : index
    %327 = vector.load %arg8[%c0_75, %c0_76] : memref<32x32xf32, #tpu.memory_space<vmem>>, vector<32x32xf32>
    %cst_77 = arith.constant dense<0.000000e+00> : vector<8x32xf32>
    %328 = tpu.matmul %324, %327, %cst_77 {dimension_numbers = #tpu.dot_dimension_numbers<[1], [0], [0], [1], [0, 0, 1, 1], [], []>} : vector<8x32xf32>, vector<32x32xf32>, vector<8x32xf32> -> vector<8x32xf32>
    %c0_78 = arith.constant 0 : index
    %c0_79 = arith.constant 0 : index
    %329 = vector.load %arg9[%c0_78, %c0_79] : memref<1x32xf32, #tpu.memory_space<vmem>>, vector<1x32xf32>
    %330 = vector.broadcast %329 : vector<1x32xf32> to vector<8x32xf32>
    %331 = arith.addf %328, %330 : vector<8x32xf32>
    %332 = math.tanh %331 : vector<8x32xf32>
    %c0_80 = arith.constant 0 : index
    %c0_81 = arith.constant 0 : index
    %333 = vector.load %arg10[%c0_80, %c0_81] : memref<1x32xf32, #tpu.memory_space<vmem>>, vector<1x32xf32>
    %334 = vector.broadcast %333 : vector<1x32xf32> to vector<8x32xf32>
    %335 = arith.mulf %332, %334 : vector<8x32xf32>
    %cst_82 = arith.constant dense<0.000000e+00> : vector<8xf32>
    %336 = vector.multi_reduction <add>, %335, %cst_82 [1] : vector<8x32xf32> to vector<8xf32>
    %337 = vector.shape_cast %336 : vector<8xf32> to vector<8x1xf32>
    %c0_83 = arith.constant 0 : index
    %338 = memref.load %arg11[%c0_83] : memref<1xf32, #tpu.memory_space<smem>>
    %339 = vector.broadcast %338 : f32 to vector<8x1xf32>
    %340 = arith.addf %337, %339 : vector<8x1xf32>
    %c0_84 = arith.constant 0 : index
    %c0_85 = arith.constant 0 : index
    %341 = vector.load %arg12[%c0_84, %c0_85] : memref<8x1xf32, #tpu.memory_space<vmem>>, vector<8x1xf32>
    tpu.vector_store %arg12[%c0_84, %c0_85], %340 {strides = array<i32>} : memref<8x1xf32, #tpu.memory_space<vmem>>, vector<8x1xf32>,
    return
  }
}

</mosaic_0001>

<bundles_post_ra>
// kernel: export_wrapper_forward.1
= control target key start
LH: loop header
LB: loop body
LE: loop exit
PB: predicated region body
PF: predicated region fallthrough
CT: control target
= control target key end

     0   :  { %vm85_vm0 = vcmask 1043456   ;;  %vm60_vm1 = vcmask 31744   ;;  %v2728_v0 = vmov 0.0|0.0   ;;  %vm2729_vm2 = vmmov 0   ;;  %s2731_s24 = smov 64   ;;  %s2732_s27 = smov 32   ;;  %s3248_s2 = inlined_call_operand.vmem [shape: f32[32,128], index: 2, kind: input, shape index: {}]   ;;  %s3249_s1 = inlined_call_operand.vmem [shape: f32[4,128], index: 1, kind: input, shape index: {}]   ;;  %s3250_s0 = inlined_call_operand.vmem [shape: f32[64,4], index: 0, kind: input, shape index: {}]   ;;  %s3251_s6 = inlined_call_operand.vmem [shape: f32[2,8,32], index: 6, kind: input, shape index: {}]   ;;  %s3252_s3 = inlined_call_operand.vmem [shape: f32[1,128], index: 3, kind: input, shape index: {}]   ;;  %s3253_s7 = inlined_call_operand.vmem [shape: f32[2,8,32], index: 7, kind: input, shape index: {}]   ;;  %s3254_s4 = inlined_call_operand.vmem [shape: f32[64,128], index: 4, kind: input, shape index: {}]   ;;  %s3255_s5 = inlined_call_operand.vmem [shape: f32[1,128], index: 5, kind: input, shape index: {}]   ;;  %s3256_s8 = inlined_call_operand.vmem [shape: f32[32,32], index: 8, kind: input, shape index: {}]   ;;  %s3257_s13 = inlined_call_operand.vmem [shape: f32[8,128], index: 13, kind: output, shape index: {1}]   ;;  %s3258_s9 = inlined_call_operand.vmem [shape: f32[1,32], index: 9, kind: input, shape index: {}]   ;;  %s3259_s10 = inlined_call_operand.vmem [shape: f32[1,32], index: 10, kind: input, shape index: {}]   ;;  %s3260_s11 = inlined_call_operand.<no memory space> [shape: f32[1], index: 11, kind: input, shape index: {}]   ;;  %s3261_s12 = inlined_call_operand.vmem [shape: f32[8,1], index: 12, kind: output, shape index: {0}]  }
   0x1   :  { %2443 = vmatprep.subr.bf16.mxu1 %v2728_v0  ;;  %v202_v1 = vld [vmem:[%s3248_s2] sm:$0xff]  ;;  %v203_v2 = vld [vmem:[%s3248_s2 + $0x8] sm:$0xff]  ;;  %v204_v7 = vld [vmem:[%s3248_s2 + $0x10] sm:$0xff]  ;;  %v2730_v8 = vmov 0.0   ;;  %vm228_vm3 = vcmask 261120   ;;  %vm340_vm4 = vcmask 523264  }
   0x2   :  { %v52_v3 = vld [vmem:[%s3249_s1] sm:$0xf]  ;;  %v2813_v4 = vpack.c.bf16 %v203_v2, %v202_v1  ;;  %v45_v6 = vld [vmem:[%s3250_s0 + $0x8] sm:$0xff]  ;;  %2200 = vmatprep.mubr.msk.f32.mxu1 %vm2729_vm2, %v2730_v8  ;;  %v205_v9 = vld [vmem:[%s3248_s2 + $0x18] sm:$0xff]  ;;  %vm1891_vm5 = vcmask 785408   ;;  %vm1994_vm6 = vcmask 7168  }
   0x3   :  { %2178 = vmatprep.subr.msk.mxu0 %vm85_vm0, %v52_v3  ;;  %v44_v5 = vld [vmem:[%s3250_s0] sm:$0xff]  ;;  %v2834_v10 = vpack.c.bf16 %v205_v9, %v204_v7  ;;  %v46_v31 = vld [vmem:[%s3250_s0 + $0x10] sm:$0xff]  ;;  %v47_v32 = vld [vmem:[%s3250_s0 + $0x18] sm:$0xff] }
   0x4   :  { %2179 = vmatpush3.msk.msra.mxu0 %vm85_vm0, %v52_v3  ;;  %2180 = vmatprep.mubr.msk.f32.mxu0 %vm60_vm1, %v44_v5  ;;  %v221_v11 = vld [vmem:[%s3251_s6] sm:$0xff]  ;;  %v207_v35 = vld [vmem:[%s3254_s4 + $0x8] sm:$0xff]  ;;  %v208_v36 = vld [vmem:[%s3254_s4 + $0x10] sm:$0xff] }
   0x5   :  { %2445 = vmatpush3.bf16.msra.mxu1 %v2813_v4  ;;  %2181 = vmatmul.mubr.msk.f32.vlgmr.msra.gmra.mrb[0].mxu0 %vm60_vm1, %v45_v6  ;;  %v2855_v13 = vld [vmem:[%s3252_s3] ss:$0 sm:$0xff]  ;;  %v209_v38 = vld [vmem:[%s3254_s4 + $0x18] sm:$0xff]  ;;  %v49_v39 = vld [vmem:[%s3250_s0 + $0x28] sm:$0xff] }
   0x6   :  { %2446 = vmatprep.subr.bf16.mxu1 %v2728_v0  ;;  %2449 = vmatprep.subr.bf16.mxu0 %v2728_v0  ;;  %v224_v20 = vld [vmem:[%s3253_s7] sm:$0xff]  ;;  %v2897_v40 = vpack.c.bf16 %v209_v38, %v208_v36  ;;  %v50_v41 = vld [vmem:[%s3250_s0 + $0x30] sm:$0xff]  ;;  %v211_v43 = vld [vmem:[%s3254_s4 + $0x28] sm:$0xff] }
   0x7   :  { %v48_v33 = vld [vmem:[%s3250_s0 + $0x20] sm:$0xff]  ;;  %2183 = vmatprep.mubr.msk.f32.mxu0 %vm60_vm1, %v46_v31  ;;  %v51_v44 = vld [vmem:[%s3250_s0 + $0x38] sm:$0xff]  ;;  %v212_v46 = vld [vmem:[%s3254_s4 + $0x30] sm:$0xff] }
   0x8   :  { %v206_v34 = vld [vmem:[%s3254_s4] sm:$0xff]  ;;  %v213_v47 = vld [vmem:[%s3254_s4 + $0x38] sm:$0xff]  ;;  %v2015_v49 = vld [vmem:[%s3251_s6 + $0x8] sm:$0xff] }
   0x9   :  { %2448 = vmatpush3.bf16.msra.mxu1 %v2834_v10  ;;  %v2886_v37 = vpack.c.bf16 %v207_v35, %v206_v34  ;;  %2184 = vmatmul.mubr.msk.f32.gmra.mrb[2].mxu0 %vm60_vm1, %v47_v32  ;;  %v210_v42 = vld [vmem:[%s3254_s4 + $0x20] sm:$0xff]  ;;  %v2932_v50 = vpack.c.bf16 %v213_v47, %v212_v46 }
   0xa   :  { %2461 = vmatprep.subr.bf16.mxu1 %v2728_v0  ;;  %2186 = vmatprep.mubr.msk.f32.mxu0 %vm60_vm1, %v48_v33  ;;  %v2915_v45 = vpack.c.bf16 %v211_v43, %v210_v42  ;;  %v2975_v63 = vld [vmem:[%s3255_s5] ss:$0 sm:$0xff] }
   0xb   :  { %2451 = vmatpush3.bf16.msra.mxu0 %v2886_v37 }
   0xc   :  { %2201 = vmatmul.mubr.msk.f32.vlgmr.msra.gmra.mrb[0].mxu1 %vm228_vm3, %v221_v11  ;;  %2452 = vmatprep.subr.bf16.mxu0 %v2728_v0 }
   0xd   :  { %2463 = vmatpush3.bf16.msra.mxu1 %v2813_v4  ;;  %2230 = vmatprep.mubr.msk.f32.mxu1 %vm2729_vm2, %v2730_v8 }
   0xe   :  { %2464 = vmatprep.subr.bf16.mxu1 %v2728_v0  ;;  %2187 = vmatmul.mubr.msk.f32.gmra.mrb[4].mxu0 %vm60_vm1, %v49_v39 }
   0xf   :  { %2189 = vmatprep.mubr.msk.f32.mxu0 %vm60_vm1, %v50_v41  ;;  %2454 = vmatpush3.bf16.msra.mxu0 %v2897_v40 }
  0x10   :  { %2455 = vmatprep.subr.bf16.mxu0 %v2728_v0 }
  0x11   :  { %2466 = vmatpush3.bf16.msra.mxu1 %v2834_v10 }
  0x12   :  { %2467 = vmatprep.subr.bf16.mxu1 %v2728_v0  ;;  %2190 = vmatmul.mubr.msk.f32.gmra.mrb[6].mxu0 %vm60_vm1, %v51_v44 }
  0x13   :  { %2219 = vmatprep.mubr.msk.f32.mxu0 %vm2729_vm2, %v2730_v8  ;;  %2457 = vmatpush3.bf16.msra.mxu0 %v2915_v45 }
  0x14   :  { %2458 = vmatprep.subr.bf16.mxu0 %v2728_v0 }
  0x17   :  { %2460 = vmatpush3.bf16.msra.mxu0 %v2932_v50 }
  0x18   :  { %2479 = vmatprep.subr.bf16.mxu0 %v2728_v0 }
  0xd8   :  { %v2850_v12 = vpop.f32.mrb[0].mxu0 }
  0xd9   :  { %v155_v14 = vpop.f32.mrb[1].mxu0  ;;  %v161_v62 = vadd.f32 %v2850_v12, %v2855_v13  ;;  %v2016_v12 = vld [vmem:[%s3253_s7 + $0x8] sm:$0xff] }
  0xda   :  { %v156_v15 = vadd.f32 %v2855_v13, %v155_v14 }
  0xdc   :  { %v2939_v53 = vpop.f32.mrb[2].mxu0 }
  0xdd   :  { %v2941_v54 = vpop.f32.mrb[3].mxu0 }
  0xde   :  { %v166_v44 = vadd.f32 %v2855_v13, %v2941_v54 }
  0xdf   :  { %v298_v16 = vpop.f32.mrb[0].mxu1 }
  0xe0   :  { %v302_v17 = vadd.f32 %v298_v16, %v156_v15  ;;  %v2202_v18 = vpop.f32.mrb[1].mxu1 }
  0xe1   :  { %v2943_v55 = vpop.f32.mrb[4].mxu0 }
  0xe2   :  { %2598 = vtanh.f32 %v302_v17  ;;  %v2018_v21 = vmul.f32 -1.442695, %v302_v17  ;;  %v2945_v56 = vpop.f32.mrb[5].mxu0 }
  0xe4   :  { %2600 = vpow2.f32 %v2018_v21 }
  0xe5   :  { %v2947_v57 = vpop.f32.mrb[6].mxu0 }
  0xe6   :  { %v2949_v58 = vpop.f32.mrb[7].mxu0 }
  0xec   :  { %v2599_v19 = vpop.eup %2598 }
  0xed   :  { %316 = vrot.lane.b32.xlu0 %v2599_v19, %s2731_s24 }
  0xee   :  { %v2601_v22 = vpop.eup %2600 }
  0xef   :  { %v306_v23 = vadd.f32 1.0, %v2601_v22 }
  0xf1   :  { %311 = vrot.lane.b32.xlu0 %v224_v20, %s2732_s27  ;;  %2602 = vrcp.f32 %v306_v23 }
  0xfb   :  { %v2603_v24 = vpop.eup %2602 }
 0x15f   :  { %v317_v25 = vpop.permute.xlu0 %316 }
 0x160   :  { %v319_v26 = vmul.f32 %v2603_v24, %v317_v25 }
 0x162   :  { %321 = vrot.lane.b32.xlu1 %v319_v26, %s2732_s27 }
 0x163   :  { %v312_v27 = vpop.permute.xlu0 %311 }
 0x164   :  { %v314_v28 = vmul.f32 %v2603_v24, %v312_v27 }
 0x1d4   :  { %v322_v29 = vpop.permute.xlu1 %321 }
 0x1d5   :  { %v2864_v30 = vadd.f32 %v322_v29, %v314_v28 }
 0x1d7   :  { %2604 = vtanh.f32 %v2864_v30 }
 0x1e1   :  { %v2605_v48 = vpop.eup %2604 }
 0x1e2   :  { %327 = vrot.lane.b32.xlu1 %v2605_v48, %s2731_s24 }
 0x1e6   :  { %336 = vrot.lane.b32.xlu1 %v2015_v49, %s2732_s27 }
 0x254   :  { %v328_v51 = vpop.permute.xlu1 %327 }
 0x255   :  { %v330_v52 = vmul.f32 %v2603_v24, %v328_v51 }
 0x257   :  { %332 = vrot.lane.b32.xlu0 %v330_v52, %s2732_s27 }
 0x258   :  { %v337_v59 = vpop.permute.xlu1 %336 }
 0x2c9   :  { %v333_v60 = vpop.permute.xlu0 %332 }
 0x2ca   :  { %v339_v61 = vsel %vm228_vm3, %v333_v60, %v337_v59  ;;  %2231 = vmatmul.mubr.msk.f32.vlgmr.msra.gmra.mrb[2].mxu1 %vm228_vm3, %v333_v60 }
 0x2cb   :  { %2220 = vmatmul.mubr.msk.f32.vlgmr.msra.gmra.mrb[8].mxu0 %vm340_vm4, %v339_v61  ;;  %2469 = vmatpush3.bf16.msra.mxu1 %v2886_v37 }
 0x2cc   :  { %2470 = vmatprep.subr.bf16.mxu1 %v2728_v0  ;;  %2481 = vmatpush3.bf16.msra.mxu0 %v2813_v4 }
 0x2cd   :  { %2482 = vmatprep.subr.bf16.mxu0 %v2728_v0  ;;  %2260 = vmatprep.mubr.msk.f32.mxu0 %vm2729_vm2, %v2730_v8 }
 0x2ce   :  { %2249 = vmatprep.mubr.msk.f32.mxu1 %vm2729_vm2, %v2730_v8 }
 0x2cf   :  { %2472 = vmatpush3.bf16.msra.mxu1 %v2897_v40 }
 0x2d0   :  { %2473 = vmatprep.subr.bf16.mxu1 %v2728_v0  ;;  %2484 = vmatpush3.bf16.msra.mxu0 %v2834_v10 }
 0x2d1   :  { %2485 = vmatprep.subr.bf16.mxu0 %v2728_v0 }
 0x2d3   :  { %2475 = vmatpush3.bf16.msra.mxu1 %v2915_v45 }
 0x2d4   :  { %2476 = vmatprep.subr.bf16.mxu1 %v2728_v0 }
 0x2d7   :  { %2478 = vmatpush3.bf16.msra.mxu1 %v2932_v50 }
 0x2d8   :  { %2497 = vmatprep.subr.bf16.mxu1 %v2728_v0 }
 0x39d   :  { %v512_v1 = vpop.f32.mrb[2].mxu1 }
 0x39e   :  { %v516_v2 = vadd.f32 %v512_v1, %v161_v62  ;;  %v410_v3 = vpop.f32.mrb[8].mxu0  ;;  %v2232_v5 = vpop.f32.mrb[3].mxu1 }
 0x39f   :  { %v411_v6 = vadd.f32 %v2975_v63, %v410_v3  ;;  %v2221_v7 = vpop.f32.mrb[9].mxu0 }
 0x3a0   :  { %2606 = vtanh.f32 %v516_v2  ;;  %v2022_v14 = vmul.f32 -1.442695, %v516_v2 }
 0x3a1   :  { %2608 = vtanh.f32 %v411_v6  ;;  %v2020_v15 = vmul.f32 -1.442695, %v411_v6 }
 0x3a2   :  { %2610 = vpow2.f32 %v2022_v14 }
 0x3a3   :  { %2612 = vpow2.f32 %v2020_v15 }
 0x3aa   :  { %v2607_v9 = vpop.eup %2606 }
 0x3ab   :  { %v2609_v11 = vpop.eup %2608  ;;  %526 = vrot.lane.b32.xlu1 %v2607_v9, %s2731_s24 }
 0x3ac   :  { %427 = vrot.lane.b32.xlu0 %v2609_v11, %s2731_s24  ;;  %v2611_v16 = vpop.eup %2610 }
 0x3ad   :  { %v2613_v17 = vpop.eup %2612  ;;  %v520_v18 = vadd.f32 1.0, %v2611_v16 }
 0x3ae   :  { %v417_v19 = vadd.f32 1.0, %v2613_v17 }
 0x3af   :  { %2614 = vrcp.f32 %v520_v18 }
 0x3b0   :  { %422 = vrot.lane.b32.xlu0 %v2016_v12, %s2732_s27  ;;  %2616 = vrcp.f32 %v417_v19 }
 0x3b9   :  { %v2615_v20 = vpop.eup %2614 }
 0x3ba   :  { %v2617_v22 = vpop.eup %2616  ;;  %v524_v27 = vmul.f32 %v2615_v20, %v2864_v30 }
 0x41d   :  { %v527_v21 = vpop.permute.xlu1 %526 }
 0x41e   :  { %v529_v23 = vmul.f32 %v2615_v20, %v527_v21  ;;  %v428_v24 = vpop.permute.xlu0 %427 }
 0x41f   :  { %v430_v25 = vmul.f32 %v2617_v22, %v428_v24 }
 0x420   :  { %531 = vrot.lane.b32.xlu0 %v529_v23, %s2732_s27 }
 0x421   :  { %432 = vrot.lane.b32.xlu1 %v430_v25, %s2732_s27 }
 0x422   :  { %v423_v26 = vpop.permute.xlu0 %422 }
 0x423   :  { %v425_v28 = vmul.f32 %v2617_v22, %v423_v26 }
 0x492   :  { %v532_v29 = vpop.permute.xlu0 %531 }
 0x493   :  { %v2987_v31 = vadd.f32 %v532_v29, %v524_v27  ;;  %v433_v32 = vpop.permute.xlu1 %432  ;;  %v171_v29 = vadd.f32 %v2939_v53, %v2855_v13 }
 0x494   :  { %v2989_v33 = vadd.f32 %v433_v32, %v425_v28 }
 0x495   :  { %2618 = vtanh.f32 %v2987_v31 }
 0x496   :  { %2620 = vtanh.f32 %v2989_v33 }
 0x49f   :  { %v2619_v34 = vpop.eup %2618 }
 0x4a0   :  { %v2621_v35 = vpop.eup %2620  ;;  %537 = vrot.lane.b32.xlu0 %v2619_v34, %s2731_s24 }
 0x4a1   :  { %438 = vrot.lane.b32.xlu1 %v2621_v35, %s2731_s24 }
 0x512   :  { %v538_v36 = vpop.permute.xlu0 %537 }
 0x513   :  { %v540_v38 = vmul.f32 %v2615_v20, %v538_v36  ;;  %v439_v30 = vpop.permute.xlu1 %438 }
 0x514   :  { %v441_v39 = vmul.f32 %v2617_v22, %v439_v30 }
 0x515   :  { %542 = vrot.lane.b32.xlu1 %v540_v38, %s2732_s27 }
 0x516   :  { %546 = vrot.lane.b32.xlu0 %v441_v39, %s2731_s24 }
 0x587   :  { %v543_v41 = vpop.permute.xlu1 %542 }
 0x588   :  { %v547_v42 = vpop.permute.xlu0 %546  ;;  %2261 = vmatmul.mubr.msk.f32.vlgmr.msra.gmra.mrb[10].mxu0 %vm228_vm3, %v543_v41 }
 0x589   :  { %v549_v43 = vsel %vm228_vm3, %v543_v41, %v547_v42  ;;  %2487 = vmatpush3.bf16.msra.mxu0 %v2886_v37  ;;  %2279 = vmatprep.mubr.msk.f32.mxu0 %vm2729_vm2, %v2730_v8 }
 0x58a   :  { %2250 = vmatmul.mubr.msk.f32.vlgmr.msra.gmra.mrb[4].mxu1 %vm340_vm4, %v549_v43  ;;  %2488 = vmatprep.subr.bf16.mxu0 %v2728_v0 }
 0x58b   :  { %2499 = vmatpush3.bf16.msra.mxu1 %v2813_v4  ;;  %2290 = vmatprep.mubr.msk.f32.mxu1 %vm2729_vm2, %v2730_v8 }
 0x58c   :  { %2500 = vmatprep.subr.bf16.mxu1 %v2728_v0 }
 0x58d   :  { %2490 = vmatpush3.bf16.msra.mxu0 %v2897_v40 }
 0x58e   :  { %2491 = vmatprep.subr.bf16.mxu0 %v2728_v0 }
 0x58f   :  { %2502 = vmatpush3.bf16.msra.mxu1 %v2834_v10 }
 0x590   :  { %2503 = vmatprep.subr.bf16.mxu1 %v2728_v0 }
 0x591   :  { %2493 = vmatpush3.bf16.msra.mxu0 %v2915_v45 }
 0x592   :  { %2494 = vmatprep.subr.bf16.mxu0 %v2728_v0 }
 0x595   :  { %2496 = vmatpush3.bf16.msra.mxu0 %v2932_v50 }
 0x596   :  { %2515 = vmatprep.subr.bf16.mxu0 %v2728_v0 }
 0x65b   :  { %v717_v46 = vpop.f32.mrb[10].mxu0 }
 0x65c   :  { %v721_v47 = vadd.f32 %v717_v46, %v166_v44  ;;  %v2262_v48 = vpop.f32.mrb[11].mxu0 }
 0x65d   :  { %v619_v49 = vpop.f32.mrb[4].mxu1 }
 0x65e   :  { %2622 = vtanh.f32 %v721_v47  ;;  %v620_v51 = vadd.f32 %v2975_v63, %v619_v49  ;;  %v2251_v52 = vpop.f32.mrb[5].mxu1  ;;  %v2026_v61 = vmul.f32 -1.442695, %v721_v47 }
 0x660   :  { %2624 = vtanh.f32 %v620_v51  ;;  %v2024_v62 = vmul.f32 -1.442695, %v620_v51 }
 0x661   :  { %2626 = vpow2.f32 %v2026_v61 }
 0x662   :  { %2628 = vpow2.f32 %v2024_v62 }
 0x668   :  { %v2623_v59 = vpop.eup %2622 }
 0x669   :  { %731 = vrot.lane.b32.xlu0 %v2623_v59, %s2731_s24 }
 0x66a   :  { %v2625_v60 = vpop.eup %2624 }
 0x66b   :  { %632 = vrot.lane.b32.xlu1 %v2625_v60, %s2731_s24  ;;  %v2627_v54 = vpop.eup %2626 }
 0x66c   :  { %v2629_v1 = vpop.eup %2628  ;;  %v725_v2 = vadd.f32 1.0, %v2627_v54 }
 0x66d   :  { %v626_v3 = vadd.f32 1.0, %v2629_v1 }
 0x66e   :  { %2630 = vrcp.f32 %v725_v2 }
 0x66f   :  { %2632 = vrcp.f32 %v626_v3 }
 0x678   :  { %v2631_v5 = vpop.eup %2630 }
 0x679   :  { %v2633_v9 = vpop.eup %2632  ;;  %v729_v14 = vmul.f32 %v2631_v5, %v2987_v31 }
 0x67a   :  { %v630_v17 = vmul.f32 %v2633_v9, %v2989_v33 }
 0x6db   :  { %v732_v6 = vpop.permute.xlu0 %731 }
 0x6dc   :  { %v734_v7 = vmul.f32 %v2631_v5, %v732_v6 }
 0x6dd   :  { %v633_v11 = vpop.permute.xlu1 %632 }
 0x6de   :  { %736 = vrot.lane.b32.xlu0 %v734_v7, %s2732_s27  ;;  %v635_v12 = vmul.f32 %v2633_v9, %v633_v11 }
 0x6e0   :  { %637 = vrot.lane.b32.xlu1 %v635_v12, %s2732_s27 }
 0x750   :  { %v737_v15 = vpop.permute.xlu0 %736 }
 0x751   :  { %v3024_v16 = vadd.f32 %v737_v15, %v729_v14  ;;  %v176_v15 = vadd.f32 %v2855_v13, %v2945_v56 }
 0x752   :  { %v638_v18 = vpop.permute.xlu1 %637 }
 0x753   :  { %2634 = vtanh.f32 %v3024_v16  ;;  %v3028_v19 = vadd.f32 %v638_v18, %v630_v17 }
 0x755   :  { %2636 = vtanh.f32 %v3028_v19 }
 0x75d   :  { %v2635_v20 = vpop.eup %2634 }
 0x75e   :  { %742 = vrot.lane.b32.xlu0 %v2635_v20, %s2731_s24 }
 0x75f   :  { %v2637_v21 = vpop.eup %2636 }
 0x760   :  { %643 = vrot.lane.b32.xlu1 %v2637_v21, %s2731_s24 }
 0x7d0   :  { %v743_v22 = vpop.permute.xlu0 %742 }
 0x7d1   :  { %v745_v23 = vmul.f32 %v2631_v5, %v743_v22 }
 0x7d2   :  { %v644_v24 = vpop.permute.xlu1 %643 }
 0x7d3   :  { %747 = vrot.lane.b32.xlu1 %v745_v23, %s2732_s27  ;;  %v646_v25 = vmul.f32 %v2633_v9, %v644_v24 }
 0x7d5   :  { %751 = vrot.lane.b32.xlu0 %v646_v25, %s2731_s24 }
 0x845   :  { %v748_v26 = vpop.permute.xlu1 %747 }
 0x846   :  { %2291 = vmatmul.mubr.msk.f32.vlgmr.msra.gmra.mrb[6].mxu1 %vm228_vm3, %v748_v26 }
 0x847   :  { %2505 = vmatpush3.bf16.msra.mxu1 %v2886_v37  ;;  %2309 = vmatprep.mubr.msk.f32.mxu1 %vm2729_vm2, %v2730_v8  ;;  %v752_v27 = vpop.permute.xlu0 %751 }
 0x848   :  { %2506 = vmatprep.subr.bf16.mxu1 %v2728_v0  ;;  %v754_v28 = vsel %vm228_vm3, %v748_v26, %v752_v27 }
 0x849   :  { %2280 = vmatmul.mubr.msk.f32.vlgmr.msra.gmra.mrb[12].mxu0 %vm340_vm4, %v754_v28 }
 0x84a   :  { %2517 = vmatpush3.bf16.msra.mxu0 %v2813_v4  ;;  %2320 = vmatprep.mubr.msk.f32.mxu0 %vm2729_vm2, %v2730_v8 }
 0x84b   :  { %2508 = vmatpush3.bf16.msra.mxu1 %v2897_v40  ;;  %2518 = vmatprep.subr.bf16.mxu0 %v2728_v0 }
 0x84c   :  { %2509 = vmatprep.subr.bf16.mxu1 %v2728_v0 }
 0x84e   :  { %2520 = vmatpush3.bf16.msra.mxu0 %v2834_v10 }
 0x84f   :  { %2511 = vmatpush3.bf16.msra.mxu1 %v2915_v45  ;;  %2521 = vmatprep.subr.bf16.mxu0 %v2728_v0 }
 0x850   :  { %2512 = vmatprep.subr.bf16.mxu1 %v2728_v0 }
 0x853   :  { %2514 = vmatpush3.bf16.msra.mxu1 %v2932_v50 }
 0x854   :  { %2533 = vmatprep.subr.bf16.mxu1 %v2728_v0 }
 0x919   :  { %v922_v31 = vpop.f32.mrb[6].mxu1 }
 0x91a   :  { %v926_v32 = vadd.f32 %v922_v31, %v171_v29  ;;  %v2292_v33 = vpop.f32.mrb[7].mxu1 }
 0x91c   :  { %2638 = vtanh.f32 %v926_v32  ;;  %v824_v34 = vpop.f32.mrb[12].mxu0  ;;  %v2030_v39 = vmul.f32 -1.442695, %v926_v32 }
 0x91d   :  { %v825_v35 = vadd.f32 %v2975_v63, %v824_v34  ;;  %v2281_v36 = vpop.f32.mrb[13].mxu0 }
 0x91f   :  { %2640 = vtanh.f32 %v825_v35  ;;  %v2028_v41 = vmul.f32 -1.442695, %v825_v35 }
 0x920   :  { %2642 = vpow2.f32 %v2030_v39 }
 0x921   :  { %2644 = vpow2.f32 %v2028_v41 }
 0x926   :  { %v2639_v38 = vpop.eup %2638 }
 0x927   :  { %936 = vrot.lane.b32.xlu0 %v2639_v38, %s2731_s24 }
 0x929   :  { %v2641_v30 = vpop.eup %2640 }
 0x92a   :  { %837 = vrot.lane.b32.xlu1 %v2641_v30, %s2731_s24  ;;  %v2643_v53 = vpop.eup %2642 }
 0x92b   :  { %v930_v42 = vadd.f32 1.0, %v2643_v53  ;;  %v2645_v43 = vpop.eup %2644 }
 0x92c   :  { %v831_v44 = vadd.f32 1.0, %v2645_v43 }
 0x92d   :  { %2646 = vrcp.f32 %v930_v42 }
 0x92e   :  { %2648 = vrcp.f32 %v831_v44 }
 0x937   :  { %v2647_v46 = vpop.eup %2646 }
 0x938   :  { %v2649_v49 = vpop.eup %2648  ;;  %v934_v59 = vmul.f32 %v2647_v46, %v3024_v16 }
 0x939   :  { %v835_v62 = vmul.f32 %v2649_v49, %v3028_v19 }
 0x999   :  { %v937_v47 = vpop.permute.xlu0 %936 }
 0x99a   :  { %v939_v48 = vmul.f32 %v2647_v46, %v937_v47 }
 0x99c   :  { %941 = vrot.lane.b32.xlu0 %v939_v48, %s2732_s27  ;;  %v838_v51 = vpop.permute.xlu1 %837 }
 0x99d   :  { %v840_v52 = vmul.f32 %v2649_v49, %v838_v51 }
 0x99f   :  { %842 = vrot.lane.b32.xlu1 %v840_v52, %s2732_s27 }
 0xa0e   :  { %v942_v60 = vpop.permute.xlu0 %941 }
 0xa0f   :  { %v3062_v61 = vadd.f32 %v942_v60, %v934_v59  ;;  %v181_v59 = vadd.f32 %v2943_v55, %v2855_v13 }
 0xa11   :  { %2650 = vtanh.f32 %v3062_v61  ;;  %v843_v54 = vpop.permute.xlu1 %842 }
 0xa12   :  { %v3066_v1 = vadd.f32 %v843_v54, %v835_v62 }
 0xa14   :  { %2652 = vtanh.f32 %v3066_v1 }
 0xa1b   :  { %v2651_v2 = vpop.eup %2650 }
 0xa1c   :  { %947 = vrot.lane.b32.xlu0 %v2651_v2, %s2731_s24 }
 0xa1e   :  { %v2653_v3 = vpop.eup %2652 }
 0xa1f   :  { %848 = vrot.lane.b32.xlu1 %v2653_v3, %s2731_s24 }
 0xa8e   :  { %v948_v5 = vpop.permute.xlu0 %947 }
 0xa8f   :  { %v950_v6 = vmul.f32 %v2647_v46, %v948_v5 }
 0xa91   :  { %952 = vrot.lane.b32.xlu1 %v950_v6, %s2732_s27  ;;  %v849_v7 = vpop.permute.xlu1 %848 }
 0xa92   :  { %v851_v9 = vmul.f32 %v2649_v49, %v849_v7 }
 0xa94   :  { %956 = vrot.lane.b32.xlu0 %v851_v9, %s2731_s24 }
 0xb03   :  { %v953_v11 = vpop.permute.xlu1 %952 }
 0xb04   :  { %2321 = vmatmul.mubr.msk.f32.vlgmr.msra.gmra.mrb[14].mxu0 %vm228_vm3, %v953_v11 }
 0xb05   :  { %2523 = vmatpush3.bf16.msra.mxu0 %v2886_v37  ;;  %2339 = vmatprep.mubr.msk.f32.mxu0 %vm2729_vm2, %v2730_v8 }
 0xb06   :  { %2524 = vmatprep.subr.bf16.mxu0 %v2728_v0  ;;  %v957_v12 = vpop.permute.xlu0 %956 }
 0xb07   :  { %v959_v14 = vsel %vm228_vm3, %v953_v11, %v957_v12 }
 0xb08   :  { %2310 = vmatmul.mubr.msk.f32.vlgmr.msra.gmra.mrb[8].mxu1 %vm340_vm4, %v959_v14 }
 0xb09   :  { %2526 = vmatpush3.bf16.msra.mxu0 %v2897_v40  ;;  %2535 = vmatpush3.bf16.msra.mxu1 %v2813_v4 }
 0xb0a   :  { %2527 = vmatprep.subr.bf16.mxu0 %v2728_v0  ;;  %2536 = vmatprep.subr.bf16.mxu1 %v2728_v0 }
 0xb0b   :  { %2350 = vmatprep.mubr.msk.f32.mxu1 %vm2729_vm2, %v2730_v8 }
 0xb0d   :  { %2529 = vmatpush3.bf16.msra.mxu0 %v2915_v45  ;;  %2538 = vmatpush3.bf16.msra.mxu1 %v2834_v10 }
 0xb0e   :  { %2530 = vmatprep.subr.bf16.mxu0 %v2728_v0  ;;  %2539 = vmatprep.subr.bf16.mxu1 %v2728_v0 }
 0xb11   :  { %2532 = vmatpush3.bf16.msra.mxu0 %v2932_v50 }
 0xb12   :  { %2551 = vmatprep.subr.bf16.mxu0 %v2728_v0 }
 0xbd7   :  { %v1127_v16 = vpop.f32.mrb[14].mxu0 }
 0xbd8   :  { %v1131_v17 = vadd.f32 %v1127_v16, %v176_v15  ;;  %v2322_v18 = vpop.f32.mrb[15].mxu0 }
 0xbda   :  { %2654 = vtanh.f32 %v1131_v17  ;;  %v2034_v24 = vmul.f32 -1.442695, %v1131_v17 }
 0xbdb   :  { %v1029_v19 = vpop.f32.mrb[8].mxu1 }
 0xbdc   :  { %v1030_v20 = vadd.f32 %v2975_v63, %v1029_v19  ;;  %v2311_v21 = vpop.f32.mrb[9].mxu1 }
 0xbde   :  { %2656 = vtanh.f32 %v1030_v20  ;;  %v2032_v25 = vmul.f32 -1.442695, %v1030_v20 }
 0xbdf   :  { %2658 = vpow2.f32 %v2034_v24 }
 0xbe0   :  { %2660 = vpow2.f32 %v2032_v25 }
 0xbe4   :  { %v2655_v22 = vpop.eup %2654 }
 0xbe5   :  { %1141 = vrot.lane.b32.xlu0 %v2655_v22, %s2731_s24 }
 0xbe8   :  { %v2657_v23 = vpop.eup %2656 }
 0xbe9   :  { %1042 = vrot.lane.b32.xlu1 %v2657_v23, %s2731_s24  ;;  %v2659_v56 = vpop.eup %2658 }
 0xbea   :  { %v1135_v26 = vadd.f32 1.0, %v2659_v56  ;;  %v2661_v27 = vpop.eup %2660 }
 0xbeb   :  { %v1036_v28 = vadd.f32 1.0, %v2661_v27 }
 0xbec   :  { %2662 = vrcp.f32 %v1135_v26 }
 0xbed   :  { %2664 = vrcp.f32 %v1036_v28 }
 0xbf6   :  { %v2663_v29 = vpop.eup %2662 }
 0xbf7   :  { %v2665_v33 = vpop.eup %2664  ;;  %v1139_v36 = vmul.f32 %v2663_v29, %v3062_v61 }
 0xbf8   :  { %v1040_v39 = vmul.f32 %v2665_v33, %v3066_v1 }
 0xc57   :  { %v1142_v31 = vpop.permute.xlu0 %1141 }
 0xc58   :  { %v1144_v32 = vmul.f32 %v2663_v29, %v1142_v31 }
 0xc5a   :  { %1146 = vrot.lane.b32.xlu0 %v1144_v32, %s2732_s27 }
 0xc5b   :  { %v1043_v34 = vpop.permute.xlu1 %1042 }
 0xc5c   :  { %v1045_v35 = vmul.f32 %v2665_v33, %v1043_v34 }
 0xc5e   :  { %1047 = vrot.lane.b32.xlu1 %v1045_v35, %s2732_s27 }
 0xccc   :  { %v1147_v38 = vpop.permute.xlu0 %1146 }
 0xccd   :  { %v3100_v30 = vadd.f32 %v1147_v38, %v1139_v36 }
 0xccf   :  { %2666 = vtanh.f32 %v3100_v30 }
 0xcd0   :  { %v1048_v41 = vpop.permute.xlu1 %1047 }
 0xcd1   :  { %v3104_v53 = vadd.f32 %v1048_v41, %v1040_v39 }
 0xcd3   :  { %2668 = vtanh.f32 %v3104_v53 }
 0xcd9   :  { %v2667_v42 = vpop.eup %2666 }
 0xcda   :  { %1152 = vrot.lane.b32.xlu0 %v2667_v42, %s2731_s24 }
 0xcdd   :  { %v2669_v43 = vpop.eup %2668 }
 0xcde   :  { %1053 = vrot.lane.b32.xlu1 %v2669_v43, %s2731_s24 }
 0xd4c   :  { %v1153_v44 = vpop.permute.xlu0 %1152 }
 0xd4d   :  { %v1155_v46 = vmul.f32 %v2663_v29, %v1153_v44 }
 0xd4f   :  { %1157 = vrot.lane.b32.xlu1 %v1155_v46, %s2732_s27 }
 0xd50   :  { %v1054_v47 = vpop.permute.xlu1 %1053 }
 0xd51   :  { %v1056_v48 = vmul.f32 %v2665_v33, %v1054_v47 }
 0xd53   :  { %1161 = vrot.lane.b32.xlu0 %v1056_v48, %s2731_s24 }
 0xdc1   :  { %v1158_v49 = vpop.permute.xlu1 %1157 }
 0xdc2   :  { %2351 = vmatmul.mubr.msk.f32.vlgmr.msra.gmra.mrb[10].mxu1 %vm228_vm3, %v1158_v49 }
 0xdc3   :  { %2541 = vmatpush3.bf16.msra.mxu1 %v2886_v37  ;;  %2369 = vmatprep.mubr.msk.f32.mxu1 %vm2729_vm2, %v2730_v8 }
 0xdc4   :  { %2542 = vmatprep.subr.bf16.mxu1 %v2728_v0 }
 0xdc5   :  { %v1162_v51 = vpop.permute.xlu0 %1161 }
 0xdc6   :  { %v1164_v52 = vsel %vm228_vm3, %v1158_v49, %v1162_v51 }
 0xdc7   :  { %2544 = vmatpush3.bf16.msra.mxu1 %v2897_v40  ;;  %2340 = vmatmul.mubr.msk.f32.vlgmr.msra.gmra.mrb[16].mxu0 %vm340_vm4, %v1164_v52 }
 0xdc8   :  { %2545 = vmatprep.subr.bf16.mxu1 %v2728_v0  ;;  %2553 = vmatpush3.bf16.msra.mxu0 %v2813_v4 }
 0xdc9   :  { %2380 = vmatprep.mubr.msk.f32.mxu0 %vm2729_vm2, %v2730_v8  ;;  %2554 = vmatprep.subr.bf16.mxu0 %v2728_v0 }
 0xdcb   :  { %2547 = vmatpush3.bf16.msra.mxu1 %v2915_v45 }
 0xdcc   :  { %2548 = vmatprep.subr.bf16.mxu1 %v2728_v0  ;;  %2556 = vmatpush3.bf16.msra.mxu0 %v2834_v10 }
 0xdcd   :  { %2557 = vmatprep.subr.bf16.mxu0 %v2728_v0 }
 0xdcf   :  { %2550 = vmatpush3.bf16.msra.mxu1 %v2932_v50 }
 0xdd0   :  { %2569 = vmatprep.subr.bf16.mxu1 %v2728_v0 }
 0xe95   :  { %v1332_v60 = vpop.f32.mrb[10].mxu1 }
 0xe96   :  { %v1336_v61 = vadd.f32 %v1332_v60, %v181_v59  ;;  %v2352_v62 = vpop.f32.mrb[11].mxu1 }
 0xe98   :  { %2670 = vtanh.f32 %v1336_v61  ;;  %v2038_v6 = vmul.f32 -1.442695, %v1336_v61 }
 0xe9a   :  { %v1234_v54 = vpop.f32.mrb[16].mxu0 }
 0xe9b   :  { %v1235_v1 = vadd.f32 %v2975_v63, %v1234_v54  ;;  %v2341_v2 = vpop.f32.mrb[17].mxu0 }
 0xe9d   :  { %2672 = vtanh.f32 %v1235_v1  ;;  %v2036_v7 = vmul.f32 -1.442695, %v1235_v1 }
 0xe9e   :  { %2674 = vpow2.f32 %v2038_v6 }
 0xe9f   :  { %2676 = vpow2.f32 %v2036_v7 }
 0xea2   :  { %v2671_v3 = vpop.eup %2670 }
 0xea3   :  { %1346 = vrot.lane.b32.xlu0 %v2671_v3, %s2731_s24 }
 0xea7   :  { %v2673_v5 = vpop.eup %2672 }
 0xea8   :  { %1247 = vrot.lane.b32.xlu1 %v2673_v5, %s2731_s24  ;;  %v2675_v55 = vpop.eup %2674 }
 0xea9   :  { %v1340_v9 = vadd.f32 1.0, %v2675_v55  ;;  %v2677_v11 = vpop.eup %2676 }
 0xeaa   :  { %v1241_v12 = vadd.f32 1.0, %v2677_v11 }
 0xeab   :  { %2678 = vrcp.f32 %v1340_v9 }
 0xeac   :  { %2680 = vrcp.f32 %v1241_v12 }
 0xeb5   :  { %v2679_v14 = vpop.eup %2678 }
 0xeb6   :  { %v2681_v17 = vpop.eup %2680  ;;  %v1344_v20 = vmul.f32 %v2679_v14, %v3100_v30 }
 0xeb7   :  { %v1245_v23 = vmul.f32 %v2681_v17, %v3104_v53 }
 0xf15   :  { %v1347_v15 = vpop.permute.xlu0 %1346 }
 0xf16   :  { %v1349_v16 = vmul.f32 %v2679_v14, %v1347_v15 }
 0xf18   :  { %1351 = vrot.lane.b32.xlu0 %v1349_v16, %s2732_s27 }
 0xf1a   :  { %v1248_v18 = vpop.permute.xlu1 %1247 }
 0xf1b   :  { %v1250_v19 = vmul.f32 %v2681_v17, %v1248_v18 }
 0xf1d   :  { %1252 = vrot.lane.b32.xlu1 %v1250_v19, %s2732_s27 }
 0xf8a   :  { %v1352_v21 = vpop.permute.xlu0 %1351 }
 0xf8b   :  { %v3138_v22 = vadd.f32 %v1352_v21, %v1344_v20 }
 0xf8d   :  { %2682 = vtanh.f32 %v3138_v22 }
 0xf8f   :  { %v1253_v24 = vpop.permute.xlu1 %1252 }
 0xf90   :  { %v3142_v25 = vadd.f32 %v1253_v24, %v1245_v23 }
 0xf92   :  { %2684 = vtanh.f32 %v3142_v25 }
 0xf97   :  { %v2683_v56 = vpop.eup %2682 }
 0xf98   :  { %1357 = vrot.lane.b32.xlu0 %v2683_v56, %s2731_s24 }
 0xf9c   :  { %v2685_v26 = vpop.eup %2684 }
 0xf9d   :  { %1258 = vrot.lane.b32.xlu1 %v2685_v26, %s2731_s24 }
0x100a   :  { %v1358_v27 = vpop.permute.xlu0 %1357 }
0x100b   :  { %v1360_v28 = vmul.f32 %v2679_v14, %v1358_v27 }
0x100d   :  { %1362 = vrot.lane.b32.xlu1 %v1360_v28, %s2732_s27 }
0x100f   :  { %v1259_v29 = vpop.permute.xlu1 %1258 }
0x1010   :  { %v1261_v31 = vmul.f32 %v2681_v17, %v1259_v29 }
0x1012   :  { %1366 = vrot.lane.b32.xlu0 %v1261_v31, %s2731_s24 }
0x107f   :  { %v1363_v32 = vpop.permute.xlu1 %1362 }
0x1080   :  { %2381 = vmatmul.mubr.msk.f32.vlgmr.msra.gmra.mrb[18].mxu0 %vm228_vm3, %v1363_v32 }
0x1081   :  { %2559 = vmatpush3.bf16.msra.mxu0 %v2886_v37  ;;  %2399 = vmatprep.mubr.msk.f32.mxu0 %vm2729_vm2, %v2730_v8 }
0x1082   :  { %2560 = vmatprep.subr.bf16.mxu0 %v2728_v0 }
0x1084   :  { %v1367_v33 = vpop.permute.xlu0 %1366 }
0x1085   :  { %2562 = vmatpush3.bf16.msra.mxu0 %v2897_v40  ;;  %v1369_v34 = vsel %vm228_vm3, %v1363_v32, %v1367_v33 }
0x1086   :  { %2563 = vmatprep.subr.bf16.mxu0 %v2728_v0  ;;  %2370 = vmatmul.mubr.msk.f32.vlgmr.msra.gmra.mrb[12].mxu1 %vm340_vm4, %v1369_v34 }
0x1087   :  { %2571 = vmatpush3.bf16.msra.mxu1 %v2813_v4  ;;  %2410 = vmatprep.mubr.msk.f32.mxu1 %vm2729_vm2, %v2730_v8  ;;  %v186_v4 = vadd.f32 %v2855_v13, %v2949_v58 }
0x1088   :  { %2572 = vmatprep.subr.bf16.mxu1 %v2728_v0 }
0x1089   :  { %2565 = vmatpush3.bf16.msra.mxu0 %v2915_v45 }
0x108a   :  { %2566 = vmatprep.subr.bf16.mxu0 %v2728_v0 }
0x108b   :  { %2574 = vmatpush3.bf16.msra.mxu1 %v2834_v10 }
0x108c   :  { %2575 = vmatprep.subr.bf16.mxu1 %v2728_v0 }
0x108d   :  { %2568 = vmatpush3.bf16.msra.mxu0 %v2932_v50 }
0x108e   :  { %2587 = vmatprep.subr.bf16.mxu0 %v2728_v0 }
0x1153   :  { %v1537_v35 = vpop.f32.mrb[18].mxu0 }
0x1154   :  { %v1541_v36 = vadd.f32 %v1537_v35, %v186_v4  ;;  %v2382_v38 = vpop.f32.mrb[19].mxu0 }
0x1156   :  { %2686 = vtanh.f32 %v1541_v36  ;;  %v2042_v42 = vmul.f32 -1.442695, %v1541_v36 }
0x1159   :  { %v1439_v30 = vpop.f32.mrb[12].mxu1 }
0x115a   :  { %v1440_v39 = vadd.f32 %v2975_v63, %v1439_v30  ;;  %v2371_v41 = vpop.f32.mrb[13].mxu1 }
0x115c   :  { %2688 = vtanh.f32 %v1440_v39  ;;  %v2040_v43 = vmul.f32 -1.442695, %v1440_v39 }
0x115d   :  { %2690 = vpow2.f32 %v2042_v42 }
0x115e   :  { %2692 = vpow2.f32 %v2040_v43 }
0x1160   :  { %v2687_v53 = vpop.eup %2686 }
0x1161   :  { %1551 = vrot.lane.b32.xlu0 %v2687_v53, %s2731_s24 }
0x1166   :  { %v2689_v10 = vpop.eup %2688 }
0x1167   :  { %1452 = vrot.lane.b32.xlu1 %v2689_v10, %s2731_s24  ;;  %v2691_v58 = vpop.eup %2690 }
0x1168   :  { %v1545_v44 = vadd.f32 1.0, %v2691_v58  ;;  %v2693_v46 = vpop.eup %2692 }
0x1169   :  { %v1446_v47 = vadd.f32 1.0, %v2693_v46 }
0x116a   :  { %2694 = vrcp.f32 %v1545_v44 }
0x116b   :  { %2696 = vrcp.f32 %v1446_v47 }
0x1174   :  { %v2695_v48 = vpop.eup %2694 }
0x1175   :  { %v2697_v52 = vpop.eup %2696  ;;  %v1549_v61 = vmul.f32 %v2695_v48, %v3138_v22 }
0x1176   :  { %v1450_v1 = vmul.f32 %v2697_v52, %v3142_v25 }
0x11d3   :  { %v1552_v49 = vpop.permute.xlu0 %1551 }
0x11d4   :  { %v1554_v51 = vmul.f32 %v2695_v48, %v1552_v49 }
0x11d6   :  { %1556 = vrot.lane.b32.xlu0 %v1554_v51, %s2732_s27 }
0x11d9   :  { %v1453_v59 = vpop.permute.xlu1 %1452 }
0x11da   :  { %v1455_v60 = vmul.f32 %v2697_v52, %v1453_v59 }
0x11dc   :  { %1457 = vrot.lane.b32.xlu1 %v1455_v60, %s2732_s27 }
0x1248   :  { %v1557_v62 = vpop.permute.xlu0 %1556 }
0x1249   :  { %v1559_v54 = vadd.f32 %v1557_v62, %v1549_v61 }
0x124b   :  { %2698 = vtanh.f32 %v1559_v54 }
0x124e   :  { %v1458_v2 = vpop.permute.xlu1 %1457 }
0x124f   :  { %v1460_v3 = vadd.f32 %v1458_v2, %v1450_v1  ;;  %v1895_v1 = vld [vmem:[%s3256_s8 + $0x8] sm:$0xff]  ;;  %v1896_v2 = vld [vmem:[%s3256_s8 + $0x10] sm:$0xff] }
0x1251   :  { %2700 = vtanh.f32 %v1460_v3 }
0x1255   :  { %v2699_v5 = vpop.eup %2698 }
0x1256   :  { %1562 = vrot.lane.b32.xlu0 %v2699_v5, %s2731_s24  ;;  %v1897_v5 = vld [vmem:[%s3256_s8 + $0x18] sm:$0xff] }
0x125b   :  { %v2701_v6 = vpop.eup %2700 }
0x125c   :  { %1463 = vrot.lane.b32.xlu1 %v2701_v6, %s2731_s24  ;;  %v2591_v6 = vpack.c.bf16 %v1897_v5, %v1896_v2 }
0x12c8   :  { %v1563_v7 = vpop.permute.xlu0 %1562 }
0x12c9   :  { %v1565_v55 = vmul.f32 %v2695_v48, %v1563_v7 }
0x12cb   :  { %1567 = vrot.lane.b32.xlu1 %v1565_v55, %s2732_s27 }
0x12ce   :  { %v1464_v9 = vpop.permute.xlu1 %1463 }
0x12cf   :  { %v1466_v11 = vmul.f32 %v2697_v52, %v1464_v9 }
0x12d1   :  { %1571 = vrot.lane.b32.xlu0 %v1466_v11, %s2731_s24 }
0x133d   :  { %v1568_v12 = vpop.permute.xlu1 %1567 }
0x133e   :  { %2411 = vmatmul.mubr.msk.f32.vlgmr.msra.gmra.mrb[14].mxu1 %vm228_vm3, %v1568_v12 }
0x133f   :  { %2577 = vmatpush3.bf16.msra.mxu1 %v2886_v37  ;;  %2429 = vmatprep.mubr.msk.f32.mxu1 %vm2729_vm2, %v2730_v8  ;;  %v191_v37 = vadd.f32 %v2947_v57, %v2855_v13 }
0x1340   :  { %2578 = vmatprep.subr.bf16.mxu1 %v2728_v0 }
0x1343   :  { %2580 = vmatpush3.bf16.msra.mxu1 %v2897_v40  ;;  %v1572_v14 = vpop.permute.xlu0 %1571 }
0x1344   :  { %2581 = vmatprep.subr.bf16.mxu1 %v2728_v0  ;;  %v1574_v15 = vsel %vm228_vm3, %v1568_v12, %v1572_v14 }
0x1345   :  { %2400 = vmatmul.mubr.msk.f32.vlgmr.msra.gmra.mrb[20].mxu0 %vm340_vm4, %v1574_v15 }
0x1346   :  { %2440 = vmatprep.mubr.msk.f32.mxu0 %vm2729_vm2, %v2730_v8 }
0x1347   :  { %2583 = vmatpush3.bf16.msra.mxu1 %v2915_v45 }
0x1348   :  { %2584 = vmatprep.subr.bf16.mxu1 %v2728_v0 }
0x134b   :  { %2586 = vmatpush3.bf16.msra.mxu1 %v2932_v50 }
0x1411   :  { %v1742_v40 = vpop.f32.mrb[14].mxu1 }
0x1412   :  { %v1746_v16 = vadd.f32 %v1742_v40, %v191_v37  ;;  %v2412_v17 = vpop.f32.mrb[15].mxu1  ;;  %v2049_v40 = vld [vmem:[%s3258_s9] ss:$0 sm:$0xff] }
0x1414   :  { %2702 = vtanh.f32 %v1746_v16  ;;  %v2046_v21 = vmul.f32 -1.442695, %v1746_v16 }
0x1418   :  { %v1644_v18 = vpop.f32.mrb[20].mxu0 }
0x1419   :  { %v1645_v19 = vadd.f32 %v2975_v63, %v1644_v18  ;;  %v2401_v20 = vpop.f32.mrb[21].mxu0 }
0x141b   :  { %2704 = vtanh.f32 %v1645_v19  ;;  %v2044_v50 = vmul.f32 -1.442695, %v1645_v19  ;;  %v2051_v19 = vld [vmem:[%s3259_s10] ss:$0 sm:$0xff] }
0x141c   :  { %2706 = vpow2.f32 %v2046_v21  ;;  %v1992_v21 = vstv %s3260_s11 }
0x141d   :  { %2708 = vpow2.f32 %v2044_v50 }
0x141e   :  { %v2703_v45 = vpop.eup %2702 }
0x141f   :  { %1756 = vrot.lane.b32.xlu0 %v2703_v45, %s2731_s24 }
0x1425   :  { %v2705_v8 = vpop.eup %2704 }
0x1426   :  { %1657 = vrot.lane.b32.xlu1 %v2705_v8, %s2731_s24  ;;  %v2707_v13 = vpop.eup %2706 }
0x1427   :  { %v1750_v57 = vadd.f32 1.0, %v2707_v13  ;;  %v2709_v22 = vpop.eup %2708 }
0x1428   :  { %v1651_v23 = vadd.f32 1.0, %v2709_v22 }
0x1429   :  { %2710 = vrcp.f32 %v1750_v57 }
0x142a   :  { %2712 = vrcp.f32 %v1651_v23 }
0x1433   :  { %v2711_v24 = vpop.eup %2710 }
0x1434   :  { %v2713_v26 = vpop.eup %2712  ;;  %v1754_v29 = vmul.f32 %v2711_v24, %v1559_v54  ;;  %v1894_v54 = vld [vmem:[%s3256_s8] sm:$0xff] }
0x1435   :  { %v1655_v33 = vmul.f32 %v2713_v26, %v1460_v3  ;;  %v2588_v3 = vpack.c.bf16 %v1895_v1, %v1894_v54 }
0x1437   :  { %2589 = vmatpush3.bf16.msra.mxu0 %v2588_v3 }
0x1438   :  { %2590 = vmatprep.subr.bf16.mxu0 %v2728_v0 }
0x143b   :  { %2592 = vmatpush3.bf16.msra.mxu0 %v2591_v6 }
0x1491   :  { %v1757_v25 = vpop.permute.xlu0 %1756 }
0x1492   :  { %v1759_v56 = vmul.f32 %v2711_v24, %v1757_v25 }
0x1494   :  { %1761 = vrot.lane.b32.xlu0 %v1759_v56, %s2732_s27 }
0x1498   :  { %v1658_v27 = vpop.permute.xlu1 %1657 }
0x1499   :  { %v1660_v28 = vmul.f32 %v2713_v26, %v1658_v27 }
0x149b   :  { %1662 = vrot.lane.b32.xlu1 %v1660_v28, %s2732_s27 }
0x1506   :  { %v1762_v31 = vpop.permute.xlu0 %1761 }
0x1507   :  { %v1764_v32 = vadd.f32 %v1762_v31, %v1754_v29 }
0x1509   :  { %2714 = vtanh.f32 %v1764_v32 }
0x150d   :  { %v1663_v34 = vpop.permute.xlu1 %1662 }
0x150e   :  { %v1665_v4 = vadd.f32 %v1663_v34, %v1655_v33 }
0x1510   :  { %2716 = vtanh.f32 %v1665_v4 }
0x1513   :  { %v2715_v35 = vpop.eup %2714 }
0x1514   :  { %1767 = vrot.lane.b32.xlu0 %v2715_v35, %s2731_s24 }
0x151a   :  { %v2717_v36 = vpop.eup %2716 }
0x151b   :  { %1668 = vrot.lane.b32.xlu1 %v2717_v36, %s2731_s24 }
0x1586   :  { %v1768_v38 = vpop.permute.xlu0 %1767 }
0x1587   :  { %v1770_v30 = vmul.f32 %v2711_v24, %v1768_v38 }
0x1589   :  { %1772 = vrot.lane.b32.xlu1 %v1770_v30, %s2732_s27 }
0x158d   :  { %v1669_v39 = vpop.permute.xlu1 %1668 }
0x158e   :  { %v1671_v41 = vmul.f32 %v2713_v26, %v1669_v39 }
0x1590   :  { %1776 = vrot.lane.b32.xlu0 %v1671_v41, %s2731_s24 }
0x15fb   :  { %v1773_v53 = vpop.permute.xlu1 %1772 }
0x1602   :  { %v1777_v10 = vpop.permute.xlu0 %1776 }
0x1603   :  { %v1779_v42 = vsel %vm228_vm3, %v1773_v53, %v1777_v10 }
0x1604   :  { %2430 = vmatmul.mubr.msk.f32.vlgmr.msra.gmra.mrb[16].mxu1 %vm340_vm4, %v1779_v42 }
0x16d7   :  { %v1849_v43 = vpop.f32.mrb[16].mxu1 }
0x16d8   :  { %v1850_v58 = vadd.f32 %v2975_v63, %v1849_v43  ;;  %v2431_v44 = vpop.f32.mrb[17].mxu1 }
0x16da   :  { %2718 = vtanh.f32 %v1850_v58  ;;  %v2048_v47 = vmul.f32 -1.442695, %v1850_v58 }
0x16dc   :  { %2720 = vpow2.f32 %v2048_v47 }
0x16e4   :  { %v2719_v46 = vpop.eup %2718 }
0x16e5   :  { %1862 = vrot.lane.b32.xlu1 %v2719_v46, %s2731_s24 }
0x16e6   :  { %v2721_v48 = vpop.eup %2720 }
0x16e7   :  { %v1856_v49 = vadd.f32 1.0, %v2721_v48 }
0x16e9   :  { %2722 = vrcp.f32 %v1856_v49 }
0x16f3   :  { %v2723_v51 = vpop.eup %2722 }
0x16f4   :  { %v1860_v60 = vmul.f32 %v2723_v51, %v1665_v4 }
0x1757   :  { %v1863_v52 = vpop.permute.xlu1 %1862 }
0x1758   :  { %v1865_v59 = vmul.f32 %v2723_v51, %v1863_v52 }
0x175a   :  { %1867 = vrot.lane.b32.xlu0 %v1865_v59, %s2732_s27 }
0x17cc   :  { %v1868_v61 = vpop.permute.xlu0 %1867 }
0x17cd   :  { %v1870_v62 = vadd.f32 %v1868_v61, %v1860_v60 }
0x17cf   :  { %2724 = vtanh.f32 %v1870_v62 }
0x17d9   :  { %v2725_v63 = vpop.eup %2724 }
0x17da   :  { %1873 = vrot.lane.b32.xlu1 %v2725_v63, %s2731_s24 }
0x184c   :  { %v1874_v7 = vpop.permute.xlu1 %1873 }
0x184d   :  { %v1876_v55 = vmul.f32 %v2723_v51, %v1874_v7 }
0x184f   :  { %1905 = vrot.lane.b32.xlu0 %v1876_v55, %s2732_s27 }
0x1853   :  { %1878 = vrot.lane.b32.xlu0 %v1876_v55, %s2731_s24 }
0x1857   :  { %1882 = vrot.lane.b32.xlu0 %v1764_v32, %s2732_s27 }
0x185b   :  { %1886 = vrot.lane.b32.xlu0 %v1870_v62, %s2731_s24 }
0x18c1   :  { %v1906_v9 = vpop.permute.xlu0 %1905 }
0x18c2   :  { %2441 = vmatmul.mubr.msk.f32.vlgmr.msra.gmra.mrb[22].mxu0 %vm228_vm3, %v1906_v9 }
0x18c5   :  { %v1879_v11 = vpop.permute.xlu0 %1878 }
0x18c6   :  { %v1889_v14 = vsel %vm228_vm3, %v1773_v53, %v1879_v11 }
0x18c9   :  { %v1883_v12 = vpop.permute.xlu0 %1882 }
0x18ca   :  { %v1890_v0 = vsel %vm340_vm4, %v1889_v14, %v1883_v12 }
0x18cd   :  { %v1887_v15 = vpop.permute.xlu0 %1886 }
0x18ce   :  { %v1892_v37 = vsel %vm1891_vm5, %v1890_v0, %v1887_v15 }
0x18cf   :  { %1893 = vst [vmem:[%s3257_s13] sm:$0xff] %v1892_v37 }
0x1995   :  { %v1975_v16 = vpop.f32.mrb[22].mxu0 }
0x1996   :  { %v1976_v17 = vadd.f32 %v2049_v40, %v1975_v16  ;;  %v2442_v18 = vpop.f32.mrb[23].mxu0 }
0x1998   :  { %2726 = vtanh.f32 %v1976_v17 }
0x19a2   :  { %v2727_v20 = vpop.eup %2726 }
0x19a3   :  { %v1987_v45 = vmul.f32 %v2727_v20, %v2051_v19 }
0x19a5   :  { %v1988_v8 = vsel %vm228_vm3, %v1987_v45, 0.0 }
0x19a6   :  { %1989 = vadd.xlane.f32.xlu1 %v1988_v8 }
0x1a33   :  { %v1990_v50 = vpop.xlane.xlu1 %1989 }
0x1a34   :  { %v1993_v13 = vadd.f32 %v1992_v21, %v1990_v50 }
0x1a36   :  { %1995 = vst.msk [vmem:[%s3261_s12] sm:$0xff] %vm1994_vm6, %v1993_v13 }

</bundles_post_ra>
